<compile_context>
chip_gen: v7x
topology: tpu7x:2x2x1
jax: 0.10.0
libtpu: 0.0.40
codegen_flags: <defaults>
</compile_context>

<pallas_src>
import jax
import jax.numpy as jnp
from jax.experimental import pallas as pl
from jax.experimental.pallas import tpu as pltpu

BN_EPS = 1e-5
KH = KW = 3


def _round_up(x, m):
    return (x + m - 1) // m * m


def _make_conv_stats_kernel(tile_h, W, Wp, Cin, cpad):
    mrows = tile_h * Wp  # conv rows per tile (includes Wp-W width-halo "garbage" columns)

    def kernel(x_ref, w_ref, y_ref, stats_ref):
        # x_ref:     (1, flat_pad, Cin)  bf16  flattened halo'd input rows for this tile
        # w_ref:     (KH*KW, Cin, cpad)  bf16  per-tap weights, cout zero-padded to 128
        # y_ref:     (tile_h*W, cpad)    f32   compact conv output rows (lane-dense)
        # stats_ref: (1, 2, cpad)        f32   per-tile [channel sum, channel sum-of-squares]
        xb = x_ref[0].astype(jnp.float32)  # unpack once; slices below are plain f32 shifts
        acc = jnp.zeros((mrows, cpad), jnp.float32)
        for kh in range(KH):
            for kw in range(KW):
                off = kh * Wp + kw  # static sublane offset of this tap
                tap = xb[off:off + mrows, :].astype(jnp.bfloat16)
                acc = acc + jnp.dot(tap, w_ref[kh * KW + kw],
                                    preferred_element_type=jnp.float32)

        # BN statistics (sum / sumsq, accumulable across tiles); exclude the
        # width-halo garbage rows (row r corresponds to w' = r % Wp; valid iff w' < W).
        r = jax.lax.broadcasted_iota(jnp.int32, (mrows, 1), 0)
        valid = (r % Wp) < W
        accm = jnp.where(valid, acc, 0.0)
        stats_ref[:, 0:1, :] = jnp.sum(accm, axis=0, keepdims=True)[None]
        stats_ref[:, 1:2, :] = jnp.sum(accm * accm, axis=0, keepdims=True)[None]

        # Compact away the width-halo columns before the HBM write: static slices
        # (sublane rotates) + 8-aligned stores, so the intermediate is fully dense.
        for h in range(tile_h):
            y_ref[h * W:(h + 1) * W, :] = acc[h * Wp:h * Wp + W, :]

    return kernel


def _bn_relu_kernel(y_ref, scale_ref, shift_ref, o_ref):
    # y * scale + shift, ReLU — lane-dense elementwise pass.
    o_ref[...] = jnp.maximum(y_ref[...] * scale_ref[...] + shift_ref[...], 0.0)


def basic_double_conv_block(x_nchw, w_oihw, bias, gamma, beta, *, tile_h=None):
    """Conv2d(in->mid, 3x3, pad=1, stride=1) -> BatchNorm2d(mid, batch stats) -> ReLU."""
    N, Cin, H, W = x_nchw.shape
    Cmid, Cin_w, kh_, kw_ = w_oihw.shape
    assert (Cin_w, kh_, kw_) == (Cin, KH, KW)
    del bias  # exactly cancelled by training-mode BN mean subtraction (see header note)

    Wp = W + 2
    cpad = max(128, _round_up(Cmid, 128))          # lane-dense channel padding

    # Pick the largest row-tile height that divides H, keeps every block a sublane
    # multiple, and keeps the per-tile f32 accumulator under ~2 MiB.
    if tile_h is None:
        cap = max(1, (2 << 20) // (Wp * cpad * 4))
        tile_h = min(H, cap)
    tile_h = max(1, min(tile_h, H))
    while tile_h > 1 and (H % tile_h or (tile_h * Wp) % 8 or (tile_h * W) % 8):
        tile_h -= 1
    assert H % tile_h == 0 and (tile_h * Wp) % 8 == 0 and (tile_h * W) % 8 == 0, \
        (tile_h, H, W, Wp)

    HT = H // tile_h
    NT = N * HT
    orows = tile_h * W                             # valid (compact) output rows per tile
    M = N * H * W                                  # total valid rows for BN stats
    flat = (tile_h + 2) * Wp
    flat_pad = _round_up(flat + 2, 8)              # +2: last-tap slice overrun into zeros

    # ---- glue: NCHW -> NHWC, spatial zero-pad, bf16, halo'd flattened row-tiles ----
    x_nhwc = jnp.transpose(x_nchw, (0, 2, 3, 1))
    xpad = jnp.pad(x_nhwc, ((0, 0), (1, 1), (1, 1), (0, 0))).astype(jnp.bfloat16)
    rows = [xpad[:, t * tile_h: t * tile_h + tile_h + 2] for t in range(HT)]
    x_halo = jnp.stack(rows, axis=1)                       # (N, HT, tile_h+2, Wp, Cin)
    x_flat = x_halo.reshape(NT, flat, Cin)
    x_flat = jnp.pad(x_flat, ((0, 0), (0, flat_pad - flat), (0, 0)))

    # Weights OIHW -> (kh, kw, cin, cout) -> (KH*KW, Cin, cpad), zero-padded cout, bf16.
    w_taps = jnp.transpose(w_oihw, (2, 3, 1, 0)).reshape(KH * KW, Cin, Cmid)
    w_taps = jnp.pad(w_taps, ((0, 0), (0, 0), (0, cpad - Cmid))).astype(jnp.bfloat16)

    # ---- pass 1: conv (MXU, implicit GEMM) + per-tile channel sum / sum-of-squares ----
    conv_kernel = _make_conv_stats_kernel(tile_h, W, Wp, Cin, cpad)
    y_rows, stats = pl.pallas_call(
        conv_kernel,
        out_shape=(jax.ShapeDtypeStruct((NT * orows, cpad), jnp.float32),
                   jax.ShapeDtypeStruct((NT, 2, cpad), jnp.float32)),
        grid=(NT,),
        in_specs=[
            pl.BlockSpec((1, flat_pad, Cin), lambda i: (i, 0, 0)),
            pl.BlockSpec((KH * KW, Cin, cpad), lambda i: (0, 0, 0)),
        ],
        out_specs=(
            pl.BlockSpec((orows, cpad), lambda i: (i, 0)),
            pl.BlockSpec((1, 2, cpad), lambda i: (i, 0, 0)),
        ),
        compiler_params=pltpu.CompilerParams(dimension_semantics=("parallel",)),
    )(x_flat, w_taps)

    # ---- fold global BN (training mode, biased variance) into per-channel scale/shift ----
    tot = jnp.sum(stats, axis=0)                   # (2, cpad)
    mean = tot[0] / M
    var = jnp.maximum(tot[1] / M - mean * mean, 0.0)
    gamma_p = jnp.pad(gamma.astype(jnp.float32), (0, cpad - Cmid))
    beta_p = jnp.pad(beta.astype(jnp.float32), (0, cpad - Cmid))
    scale = gamma_p * jax.lax.rsqrt(var + BN_EPS)
    shift = beta_p - mean * scale
    scale2 = scale.reshape(1, cpad)
    shift2 = shift.reshape(1, cpad)

    # ---- pass 2: apply scale/shift + ReLU over the compact rows, few big tiles ----
    rows_total = NT * orows                        # == N*H*W
    if rows_total % 8 == 0:
        cap_rows = max(8, (4 << 20) // (cpad * 4))  # <= 4 MiB per block
        tile2 = 8
        for cand in range(8, min(rows_total, cap_rows) + 1, 8):
            if rows_total % cand == 0:
                tile2 = cand
    else:
        tile2 = rows_total                          # single full block
    out_rows = pl.pallas_call(
        _bn_relu_kernel,
        out_shape=jax.ShapeDtypeStruct((rows_total, cpad), jnp.float32),
        grid=(rows_total // tile2,),
        in_specs=[
            pl.BlockSpec((tile2, cpad), lambda i: (i, 0)),
            pl.BlockSpec((1, cpad), lambda i: (0, 0)),
            pl.BlockSpec((1, cpad), lambda i: (0, 0)),
        ],
        out_specs=pl.BlockSpec((tile2, cpad), lambda i: (i, 0)),
        compiler_params=pltpu.CompilerParams(dimension_semantics=("parallel",)),
    )(y_rows, scale2, shift2)

    # ---- glue: drop padded channels, back to NCHW (rows are already compact) ----
    out = out_rows.reshape(N, H, W, cpad)[..., :Cmid]
    return jnp.transpose(out, (0, 3, 1, 2))


def reference(x, w, b, gamma, beta):
    """Pure-JAX reference for Conv2d(bias) + BatchNorm2d(training stats) + ReLU.
    Inputs/weights are quantized to bf16 to mirror the kernel's bf16 HBM/MXU streams."""
    xq = x.astype(jnp.bfloat16).astype(jnp.float32)
    wq = w.astype(jnp.bfloat16).astype(jnp.float32)
    y = jax.lax.conv_general_dilated(
        xq, wq, window_strides=(1, 1), padding=((1, 1), (1, 1)),
        dimension_numbers=("NCHW", "OIHW", "NCHW"))
    y = y + b.reshape(1, -1, 1, 1)
    mean = jnp.mean(y, axis=(0, 2, 3), keepdims=True)
    var = jnp.mean((y - mean) ** 2, axis=(0, 2, 3), keepdims=True)
    xhat = (y - mean) * jax.lax.rsqrt(var + BN_EPS)
    y = gamma.reshape(1, -1, 1, 1) * xhat + beta.reshape(1, -1, 1, 1)
    return jnp.maximum(y, 0.0)


if __name__ == "__main__":
    N, Cin, H, W = 2, 4, 16, 16
    Cmid = 8  # middle_channels (out_channels is unused by the module's forward)

    key = jax.random.PRNGKey(0)
    kx, kw, kb = jax.random.split(key, 3)
    x = jax.random.normal(kx, (N, Cin, H, W), dtype=jnp.float32)
    w = jax.random.normal(kw, (Cmid, Cin, 3, 3), dtype=jnp.float32) * 0.1
    b = jax.random.normal(kb, (Cmid,), dtype=jnp.float32) * 0.1
    gamma = jnp.ones((Cmid,), dtype=jnp.float32)   # BatchNorm2d default weight
    beta = jnp.zeros((Cmid,), dtype=jnp.float32)   # BatchNorm2d default bias

    out = jax.block_until_ready(basic_double_conv_block(x, w, b, gamma, beta))

    ref = reference(x, w, b, gamma, beta)
    assert out.shape == (N, Cmid, H, W), out.shape
    max_err = float(jnp.max(jnp.abs(out - ref)))
    assert jnp.allclose(out, ref, rtol=1e-3, atol=1e-3), max_err

    print("KERNEL_OK")
</pallas_src>

<mosaic_0001>
module attributes {stable_mosaic.version = 11 : i64} {
  func.func @kernel(%arg0: i32, %arg1: memref<1x328x4xbf16, #tpu.memory_space<vmem>>, %arg2: memref<9x4x128xbf16, #tpu.memory_space<vmem>>, %arg3: memref<256x128xf32, #tpu.memory_space<vmem>>, %arg4: memref<1x2x128xf32, #tpu.memory_space<vmem>>) attributes {dimension_semantics = [#tpu.dimension_semantics<parallel>], iteration_bounds = array<i64: 2>, scalar_prefetch = 0 : i64, scratch_operands = 0 : i64, tpu.core_type = #tpu.core_type<tc>, window_params = [{transform_indices = @transform_0, window_bounds = array<i64: 1, 328, 4>}, {pipeline_mode = #tpu.pipeline_mode<synchronous>, transform_indices = @transform_1, window_bounds = array<i64: 9, 4, 128>}, {transform_indices = @transform_2, window_bounds = array<i64: 256, 128>}, {transform_indices = @transform_3, window_bounds = array<i64: 1, 2, 128>}]} {
    %c0 = arith.constant 0 : index
    %c0_0 = arith.constant 0 : index
    %c0_1 = arith.constant 0 : index
    %0 = vector.load %arg1[%c0, %c0_0, %c0_1] : memref<1x328x4xbf16, #tpu.memory_space<vmem>>, vector<1x328x4xbf16>
    %1 = vector.shape_cast %0 : vector<1x328x4xbf16> to vector<328x4xbf16>
    %2 = arith.extf %1 : vector<328x4xbf16> to vector<328x4xf32>
    %cst = arith.constant 0.000000e+00 : f32
    %3 = vector.broadcast %cst : f32 to vector<288x128xf32>
    %4 = vector.extract_strided_slice %2 {offsets = [0, 0], sizes = [288, 4], strides = [1, 1]} : vector<328x4xf32> to vector<288x4xf32>
    %5 = arith.truncf %4 : vector<288x4xf32> to vector<288x4xbf16>
    %c0_2 = arith.constant 0 : index
    %c0_3 = arith.constant 0 : index
    %c0_4 = arith.constant 0 : index
    %6 = vector.load %arg2[%c0_2, %c0_3, %c0_4] : memref<9x4x128xbf16, #tpu.memory_space<vmem>>, vector<1x4x128xbf16>
    %7 = vector.shape_cast %6 : vector<1x4x128xbf16> to vector<4x128xbf16>
    %cst_5 = arith.constant dense<0.000000e+00> : vector<288x128xf32>
    %8 = tpu.matmul %5, %7, %cst_5 {dimension_numbers = #tpu.dot_dimension_numbers<[1], [0], [0], [1], [0, 0, 1, 1], [], []>} : vector<288x4xbf16>, vector<4x128xbf16>, vector<288x128xf32> -> vector<288x128xf32>
    %9 = arith.addf %3, %8 : vector<288x128xf32>
    %10 = vector.extract_strided_slice %2 {offsets = [1, 0], sizes = [288, 4], strides = [1, 1]} : vector<328x4xf32> to vector<288x4xf32>
    %11 = arith.truncf %10 : vector<288x4xf32> to vector<288x4xbf16>
    %c1 = arith.constant 1 : index
    %c0_6 = arith.constant 0 : index
    %c0_7 = arith.constant 0 : index
    %12 = vector.load %arg2[%c1, %c0_6, %c0_7] : memref<9x4x128xbf16, #tpu.memory_space<vmem>>, vector<1x4x128xbf16>
    %13 = vector.shape_cast %12 : vector<1x4x128xbf16> to vector<4x128xbf16>
    %cst_8 = arith.constant dense<0.000000e+00> : vector<288x128xf32>
    %14 = tpu.matmul %11, %13, %cst_8 {dimension_numbers = #tpu.dot_dimension_numbers<[1], [0], [0], [1], [0, 0, 1, 1], [], []>} : vector<288x4xbf16>, vector<4x128xbf16>, vector<288x128xf32> -> vector<288x128xf32>
    %15 = arith.addf %9, %14 : vector<288x128xf32>
    %16 = vector.extract_strided_slice %2 {offsets = [2, 0], sizes = [288, 4], strides = [1, 1]} : vector<328x4xf32> to vector<288x4xf32>
    %17 = arith.truncf %16 : vector<288x4xf32> to vector<288x4xbf16>
    %c2 = arith.constant 2 : index
    %c0_9 = arith.constant 0 : index
    %c0_10 = arith.constant 0 : index
    %18 = vector.load %arg2[%c2, %c0_9, %c0_10] : memref<9x4x128xbf16, #tpu.memory_space<vmem>>, vector<1x4x128xbf16>
    %19 = vector.shape_cast %18 : vector<1x4x128xbf16> to vector<4x128xbf16>
    %cst_11 = arith.constant dense<0.000000e+00> : vector<288x128xf32>
    %20 = tpu.matmul %17, %19, %cst_11 {dimension_numbers = #tpu.dot_dimension_numbers<[1], [0], [0], [1], [0, 0, 1, 1], [], []>} : vector<288x4xbf16>, vector<4x128xbf16>, vector<288x128xf32> -> vector<288x128xf32>
    %21 = arith.addf %15, %20 : vector<288x128xf32>
    %22 = vector.extract_strided_slice %2 {offsets = [18, 0], sizes = [288, 4], strides = [1, 1]} : vector<328x4xf32> to vector<288x4xf32>
    %23 = arith.truncf %22 : vector<288x4xf32> to vector<288x4xbf16>
    %c3 = arith.constant 3 : index
    %c0_12 = arith.constant 0 : index
    %c0_13 = arith.constant 0 : index
    %24 = vector.load %arg2[%c3, %c0_12, %c0_13] : memref<9x4x128xbf16, #tpu.memory_space<vmem>>, vector<1x4x128xbf16>
    %25 = vector.shape_cast %24 : vector<1x4x128xbf16> to vector<4x128xbf16>
    %cst_14 = arith.constant dense<0.000000e+00> : vector<288x128xf32>
    %26 = tpu.matmul %23, %25, %cst_14 {dimension_numbers = #tpu.dot_dimension_numbers<[1], [0], [0], [1], [0, 0, 1, 1], [], []>} : vector<288x4xbf16>, vector<4x128xbf16>, vector<288x128xf32> -> vector<288x128xf32>
    %27 = arith.addf %21, %26 : vector<288x128xf32>
    %28 = vector.extract_strided_slice %2 {offsets = [19, 0], sizes = [288, 4], strides = [1, 1]} : vector<328x4xf32> to vector<288x4xf32>
    %29 = arith.truncf %28 : vector<288x4xf32> to vector<288x4xbf16>
    %c4 = arith.constant 4 : index
    %c0_15 = arith.constant 0 : index
    %c0_16 = arith.constant 0 : index
    %30 = vector.load %arg2[%c4, %c0_15, %c0_16] : memref<9x4x128xbf16, #tpu.memory_space<vmem>>, vector<1x4x128xbf16>
    %31 = vector.shape_cast %30 : vector<1x4x128xbf16> to vector<4x128xbf16>
    %cst_17 = arith.constant dense<0.000000e+00> : vector<288x128xf32>
    %32 = tpu.matmul %29, %31, %cst_17 {dimension_numbers = #tpu.dot_dimension_numbers<[1], [0], [0], [1], [0, 0, 1, 1], [], []>} : vector<288x4xbf16>, vector<4x128xbf16>, vector<288x128xf32> -> vector<288x128xf32>
    %33 = arith.addf %27, %32 : vector<288x128xf32>
    %34 = vector.extract_strided_slice %2 {offsets = [20, 0], sizes = [288, 4], strides = [1, 1]} : vector<328x4xf32> to vector<288x4xf32>
    %35 = arith.truncf %34 : vector<288x4xf32> to vector<288x4xbf16>
    %c5 = arith.constant 5 : index
    %c0_18 = arith.constant 0 : index
    %c0_19 = arith.constant 0 : index
    %36 = vector.load %arg2[%c5, %c0_18, %c0_19] : memref<9x4x128xbf16, #tpu.memory_space<vmem>>, vector<1x4x128xbf16>
    %37 = vector.shape_cast %36 : vector<1x4x128xbf16> to vector<4x128xbf16>
    %cst_20 = arith.constant dense<0.000000e+00> : vector<288x128xf32>
    %38 = tpu.matmul %35, %37, %cst_20 {dimension_numbers = #tpu.dot_dimension_numbers<[1], [0], [0], [1], [0, 0, 1, 1], [], []>} : vector<288x4xbf16>, vector<4x128xbf16>, vector<288x128xf32> -> vector<288x128xf32>
    %39 = arith.addf %33, %38 : vector<288x128xf32>
    %40 = vector.extract_strided_slice %2 {offsets = [36, 0], sizes = [288, 4], strides = [1, 1]} : vector<328x4xf32> to vector<288x4xf32>
    %41 = arith.truncf %40 : vector<288x4xf32> to vector<288x4xbf16>
    %c6 = arith.constant 6 : index
    %c0_21 = arith.constant 0 : index
    %c0_22 = arith.constant 0 : index
    %42 = vector.load %arg2[%c6, %c0_21, %c0_22] : memref<9x4x128xbf16, #tpu.memory_space<vmem>>, vector<1x4x128xbf16>
    %43 = vector.shape_cast %42 : vector<1x4x128xbf16> to vector<4x128xbf16>
    %cst_23 = arith.constant dense<0.000000e+00> : vector<288x128xf32>
    %44 = tpu.matmul %41, %43, %cst_23 {dimension_numbers = #tpu.dot_dimension_numbers<[1], [0], [0], [1], [0, 0, 1, 1], [], []>} : vector<288x4xbf16>, vector<4x128xbf16>, vector<288x128xf32> -> vector<288x128xf32>
    %45 = arith.addf %39, %44 : vector<288x128xf32>
    %46 = vector.extract_strided_slice %2 {offsets = [37, 0], sizes = [288, 4], strides = [1, 1]} : vector<328x4xf32> to vector<288x4xf32>
    %47 = arith.truncf %46 : vector<288x4xf32> to vector<288x4xbf16>
    %c7 = arith.constant 7 : index
    %c0_24 = arith.constant 0 : index
    %c0_25 = arith.constant 0 : index
    %48 = vector.load %arg2[%c7, %c0_24, %c0_25] : memref<9x4x128xbf16, #tpu.memory_space<vmem>>, vector<1x4x128xbf16>
    %49 = vector.shape_cast %48 : vector<1x4x128xbf16> to vector<4x128xbf16>
    %cst_26 = arith.constant dense<0.000000e+00> : vector<288x128xf32>
    %50 = tpu.matmul %47, %49, %cst_26 {dimension_numbers = #tpu.dot_dimension_numbers<[1], [0], [0], [1], [0, 0, 1, 1], [], []>} : vector<288x4xbf16>, vector<4x128xbf16>, vector<288x128xf32> -> vector<288x128xf32>
    %51 = arith.addf %45, %50 : vector<288x128xf32>
    %52 = vector.extract_strided_slice %2 {offsets = [38, 0], sizes = [288, 4], strides = [1, 1]} : vector<328x4xf32> to vector<288x4xf32>
    %53 = arith.truncf %52 : vector<288x4xf32> to vector<288x4xbf16>
    %c8 = arith.constant 8 : index
    %c0_27 = arith.constant 0 : index
    %c0_28 = arith.constant 0 : index
    %54 = vector.load %arg2[%c8, %c0_27, %c0_28] : memref<9x4x128xbf16, #tpu.memory_space<vmem>>, vector<1x4x128xbf16>
    %55 = vector.shape_cast %54 : vector<1x4x128xbf16> to vector<4x128xbf16>
    %cst_29 = arith.constant dense<0.000000e+00> : vector<288x128xf32>
    %56 = tpu.matmul %53, %55, %cst_29 {dimension_numbers = #tpu.dot_dimension_numbers<[1], [0], [0], [1], [0, 0, 1, 1], [], []>} : vector<288x4xbf16>, vector<4x128xbf16>, vector<288x128xf32> -> vector<288x128xf32>
    %57 = arith.addf %51, %56 : vector<288x128xf32>
    %58 = tpu.iota {dimensions = array<i32: 0>} : vector<288x1xi32>
    %c18_i32 = arith.constant 18 : i32
    %c0_i32 = arith.constant 0 : i32
    %59 = arith.cmpi eq, %c18_i32, %c0_i32 : i32
    %c1_i32 = arith.constant 1 : i32
    %60 = arith.select %59, %c1_i32, %c18_i32 : i32
    %61 = vector.broadcast %60 : i32 to vector<288x1xi32>
    %62 = arith.remsi %58, %61 : vector<288x1xi32>
    %c0_i32_30 = arith.constant 0 : i32
    %63 = vector.broadcast %c0_i32_30 : i32 to vector<288x1xi32>
    %64 = arith.cmpi ne, %62, %63 : vector<288x1xi32>
    %c0_i32_31 = arith.constant 0 : i32
    %65 = vector.broadcast %c0_i32_31 : i32 to vector<288x1xi32>
    %66 = arith.cmpi slt, %62, %65 : vector<288x1xi32>
    %c0_i32_32 = arith.constant 0 : i32
    %67 = arith.cmpi slt, %60, %c0_i32_32 : i32
    %68 = vector.broadcast %67 : i1 to vector<288x1xi1>
    %69 = vector.broadcast %68 : vector<288x1xi1> to vector<288x1xi1>
    %70 = arith.xori %66, %69 : vector<288x1xi1>
    %71 = arith.andi %70, %64 : vector<288x1xi1>
    %72 = vector.broadcast %60 : i32 to vector<288x1xi32>
    %73 = arith.addi %62, %72 : vector<288x1xi32>
    %74 = arith.select %71, %73, %62 : vector<288x1xi1>, vector<288x1xi32>
    %c16_i32 = arith.constant 16 : i32
    %75 = vector.broadcast %c16_i32 : i32 to vector<288x1xi32>
    %76 = arith.cmpi slt, %74, %75 : vector<288x1xi32>
    %cst_33 = arith.constant 0.000000e+00 : f32
    %77 = vector.shape_cast %76 : vector<288x1xi1> to vector<288x1xi1>
    %78 = vector.broadcast %77 : vector<288x1xi1> to vector<288x128xi1>
    %79 = vector.broadcast %cst_33 : f32 to vector<288x128xf32>
    %80 = arith.select %78, %57, %79 : vector<288x128xi1>, vector<288x128xf32>
    %cst_34 = arith.constant dense<0.000000e+00> : vector<128xf32>
    %81 = vector.multi_reduction <add>, %80, %cst_34 [0] : vector<288x128xf32> to vector<128xf32>
    %82 = vector.shape_cast %81 : vector<128xf32> to vector<1x128xf32>
    %83 = vector.shape_cast %82 : vector<1x128xf32> to vector<1x1x128xf32>
    %c0_35 = arith.constant 0 : index
    %c0_36 = arith.constant 0 : index
    %c0_37 = arith.constant 0 : index
    %84 = vector.load %arg4[%c0_35, %c0_36, %c0_37] : memref<1x2x128xf32, #tpu.memory_space<vmem>>, vector<1x1x128xf32>
    tpu.vector_store %arg4[%c0_35, %c0_36, %c0_37], %83 {strides = array<i32>} : memref<1x2x128xf32, #tpu.memory_space<vmem>>, vector<1x1x128xf32>,
    %85 = arith.mulf %80, %80 : vector<288x128xf32>
    %cst_38 = arith.constant dense<0.000000e+00> : vector<128xf32>
    %86 = vector.multi_reduction <add>, %85, %cst_38 [0] : vector<288x128xf32> to vector<128xf32>
    %87 = vector.shape_cast %86 : vector<128xf32> to vector<1x128xf32>
    %88 = vector.shape_cast %87 : vector<1x128xf32> to vector<1x1x128xf32>
    %c0_39 = arith.constant 0 : index
    %c1_40 = arith.constant 1 : index
    %c0_41 = arith.constant 0 : index
    %89 = vector.load %arg4[%c0_39, %c1_40, %c0_41] : memref<1x2x128xf32, #tpu.memory_space<vmem>>, vector<1x1x128xf32>
    tpu.vector_store %arg4[%c0_39, %c1_40, %c0_41], %88 {strides = array<i32>} : memref<1x2x128xf32, #tpu.memory_space<vmem>>, vector<1x1x128xf32>,
    %90 = vector.extract_strided_slice %57 {offsets = [0, 0], sizes = [16, 128], strides = [1, 1]} : vector<288x128xf32> to vector<16x128xf32>
    %c0_42 = arith.constant 0 : index
    %c0_43 = arith.constant 0 : index
    %91 = vector.load %arg3[%c0_42, %c0_43] : memref<256x128xf32, #tpu.memory_space<vmem>>, vector<16x128xf32>
    tpu.vector_store %arg3[%c0_42, %c0_43], %90 {strides = array<i32>} : memref<256x128xf32, #tpu.memory_space<vmem>>, vector<16x128xf32>,
    %92 = vector.extract_strided_slice %57 {offsets = [18, 0], sizes = [16, 128], strides = [1, 1]} : vector<288x128xf32> to vector<16x128xf32>
    %c16 = arith.constant 16 : index
    %c0_44 = arith.constant 0 : index
    %93 = vector.load %arg3[%c16, %c0_44] : memref<256x128xf32, #tpu.memory_space<vmem>>, vector<16x128xf32>
    tpu.vector_store %arg3[%c16, %c0_44], %92 {strides = array<i32>} : memref<256x128xf32, #tpu.memory_space<vmem>>, vector<16x128xf32>,
    %94 = vector.extract_strided_slice %57 {offsets = [36, 0], sizes = [16, 128], strides = [1, 1]} : vector<288x128xf32> to vector<16x128xf32>
    %c32 = arith.constant 32 : index
    %c0_45 = arith.constant 0 : index
    %95 = vector.load %arg3[%c32, %c0_45] : memref<256x128xf32, #tpu.memory_space<vmem>>, vector<16x128xf32>
    tpu.vector_store %arg3[%c32, %c0_45], %94 {strides = array<i32>} : memref<256x128xf32, #tpu.memory_space<vmem>>, vector<16x128xf32>,
    %96 = vector.extract_strided_slice %57 {offsets = [54, 0], sizes = [16, 128], strides = [1, 1]} : vector<288x128xf32> to vector<16x128xf32>
    %c48 = arith.constant 48 : index
    %c0_46 = arith.constant 0 : index
    %97 = vector.load %arg3[%c48, %c0_46] : memref<256x128xf32, #tpu.memory_space<vmem>>, vector<16x128xf32>
    tpu.vector_store %arg3[%c48, %c0_46], %96 {strides = array<i32>} : memref<256x128xf32, #tpu.memory_space<vmem>>, vector<16x128xf32>,
    %98 = vector.extract_strided_slice %57 {offsets = [72, 0], sizes = [16, 128], strides = [1, 1]} : vector<288x128xf32> to vector<16x128xf32>
    %c64 = arith.constant 64 : index
    %c0_47 = arith.constant 0 : index
    %99 = vector.load %arg3[%c64, %c0_47] : memref<256x128xf32, #tpu.memory_space<vmem>>, vector<16x128xf32>
    tpu.vector_store %arg3[%c64, %c0_47], %98 {strides = array<i32>} : memref<256x128xf32, #tpu.memory_space<vmem>>, vector<16x128xf32>,
    %100 = vector.extract_strided_slice %57 {offsets = [90, 0], sizes = [16, 128], strides = [1, 1]} : vector<288x128xf32> to vector<16x128xf32>
    %c80 = arith.constant 80 : index
    %c0_48 = arith.constant 0 : index
    %101 = vector.load %arg3[%c80, %c0_48] : memref<256x128xf32, #tpu.memory_space<vmem>>, vector<16x128xf32>
    tpu.vector_store %arg3[%c80, %c0_48], %100 {strides = array<i32>} : memref<256x128xf32, #tpu.memory_space<vmem>>, vector<16x128xf32>,
    %102 = vector.extract_strided_slice %57 {offsets = [108, 0], sizes = [16, 128], strides = [1, 1]} : vector<288x128xf32> to vector<16x128xf32>
    %c96 = arith.constant 96 : index
    %c0_49 = arith.constant 0 : index
    %103 = vector.load %arg3[%c96, %c0_49] : memref<256x128xf32, #tpu.memory_space<vmem>>, vector<16x128xf32>
    tpu.vector_store %arg3[%c96, %c0_49], %102 {strides = array<i32>} : memref<256x128xf32, #tpu.memory_space<vmem>>, vector<16x128xf32>,
    %104 = vector.extract_strided_slice %57 {offsets = [126, 0], sizes = [16, 128], strides = [1, 1]} : vector<288x128xf32> to vector<16x128xf32>
    %c112 = arith.constant 112 : index
    %c0_50 = arith.constant 0 : index
    %105 = vector.load %arg3[%c112, %c0_50] : memref<256x128xf32, #tpu.memory_space<vmem>>, vector<16x128xf32>
    tpu.vector_store %arg3[%c112, %c0_50], %104 {strides = array<i32>} : memref<256x128xf32, #tpu.memory_space<vmem>>, vector<16x128xf32>,
    %106 = vector.extract_strided_slice %57 {offsets = [144, 0], sizes = [16, 128], strides = [1, 1]} : vector<288x128xf32> to vector<16x128xf32>
    %c128 = arith.constant 128 : index
    %c0_51 = arith.constant 0 : index
    %107 = vector.load %arg3[%c128, %c0_51] : memref<256x128xf32, #tpu.memory_space<vmem>>, vector<16x128xf32>
    tpu.vector_store %arg3[%c128, %c0_51], %106 {strides = array<i32>} : memref<256x128xf32, #tpu.memory_space<vmem>>, vector<16x128xf32>,
    %108 = vector.extract_strided_slice %57 {offsets = [162, 0], sizes = [16, 128], strides = [1, 1]} : vector<288x128xf32> to vector<16x128xf32>
    %c144 = arith.constant 144 : index
    %c0_52 = arith.constant 0 : index
    %109 = vector.load %arg3[%c144, %c0_52] : memref<256x128xf32, #tpu.memory_space<vmem>>, vector<16x128xf32>
    tpu.vector_store %arg3[%c144, %c0_52], %108 {strides = array<i32>} : memref<256x128xf32, #tpu.memory_space<vmem>>, vector<16x128xf32>,
    %110 = vector.extract_strided_slice %57 {offsets = [180, 0], sizes = [16, 128], strides = [1, 1]} : vector<288x128xf32> to vector<16x128xf32>
    %c160 = arith.constant 160 : index
    %c0_53 = arith.constant 0 : index
    %111 = vector.load %arg3[%c160, %c0_53] : memref<256x128xf32, #tpu.memory_space<vmem>>, vector<16x128xf32>
    tpu.vector_store %arg3[%c160, %c0_53], %110 {strides = array<i32>} : memref<256x128xf32, #tpu.memory_space<vmem>>, vector<16x128xf32>,
    %112 = vector.extract_strided_slice %57 {offsets = [198, 0], sizes = [16, 128], strides = [1, 1]} : vector<288x128xf32> to vector<16x128xf32>
    %c176 = arith.constant 176 : index
    %c0_54 = arith.constant 0 : index
    %113 = vector.load %arg3[%c176, %c0_54] : memref<256x128xf32, #tpu.memory_space<vmem>>, vector<16x128xf32>
    tpu.vector_store %arg3[%c176, %c0_54], %112 {strides = array<i32>} : memref<256x128xf32, #tpu.memory_space<vmem>>, vector<16x128xf32>,
    %114 = vector.extract_strided_slice %57 {offsets = [216, 0], sizes = [16, 128], strides = [1, 1]} : vector<288x128xf32> to vector<16x128xf32>
    %c192 = arith.constant 192 : index
    %c0_55 = arith.constant 0 : index
    %115 = vector.load %arg3[%c192, %c0_55] : memref<256x128xf32, #tpu.memory_space<vmem>>, vector<16x128xf32>
    tpu.vector_store %arg3[%c192, %c0_55], %114 {strides = array<i32>} : memref<256x128xf32, #tpu.memory_space<vmem>>, vector<16x128xf32>,
    %116 = vector.extract_strided_slice %57 {offsets = [234, 0], sizes = [16, 128], strides = [1, 1]} : vector<288x128xf32> to vector<16x128xf32>
    %c208 = arith.constant 208 : index
    %c0_56 = arith.constant 0 : index
    %117 = vector.load %arg3[%c208, %c0_56] : memref<256x128xf32, #tpu.memory_space<vmem>>, vector<16x128xf32>
    tpu.vector_store %arg3[%c208, %c0_56], %116 {strides = array<i32>} : memref<256x128xf32, #tpu.memory_space<vmem>>, vector<16x128xf32>,
    %118 = vector.extract_strided_slice %57 {offsets = [252, 0], sizes = [16, 128], strides = [1, 1]} : vector<288x128xf32> to vector<16x128xf32>
    %c224 = arith.constant 224 : index
    %c0_57 = arith.constant 0 : index
    %119 = vector.load %arg3[%c224, %c0_57] : memref<256x128xf32, #tpu.memory_space<vmem>>, vector<16x128xf32>
    tpu.vector_store %arg3[%c224, %c0_57], %118 {strides = array<i32>} : memref<256x128xf32, #tpu.memory_space<vmem>>, vector<16x128xf32>,
    %120 = vector.extract_strided_slice %57 {offsets = [270, 0], sizes = [16, 128], strides = [1, 1]} : vector<288x128xf32> to vector<16x128xf32>
    %c240 = arith.constant 240 : index
    %c0_58 = arith.constant 0 : index
    %121 = vector.load %arg3[%c240, %c0_58] : memref<256x128xf32, #tpu.memory_space<vmem>>, vector<16x128xf32>
    tpu.vector_store %arg3[%c240, %c0_58], %120 {strides = array<i32>} : memref<256x128xf32, #tpu.memory_space<vmem>>, vector<16x128xf32>,
    return
  }
  func.func @transform_0(%arg0: i32) -> (i32, i32, i32) {
    %c0_i32 = arith.constant 0 : i32
    %c0_i32_0 = arith.constant 0 : i32
    %c0_i32_1 = arith.constant 0 : i32
    return %arg0, %c0_i32, %c0_i32_0 : i32, i32, i32
  }
  func.func @transform_1(%arg0: i32) -> (i32, i32, i32) {
    %c0_i32 = arith.constant 0 : i32
    %c0_i32_0 = arith.constant 0 : i32
    %c0_i32_1 = arith.constant 0 : i32
    %c0_i32_2 = arith.constant 0 : i32
    return %c0_i32, %c0_i32_0, %c0_i32_1 : i32, i32, i32
  }
  func.func @transform_2(%arg0: i32) -> (i32, i32) {
    %c0_i32 = arith.constant 0 : i32
    %c0_i32_0 = arith.constant 0 : i32
    return %arg0, %c0_i32 : i32, i32
  }
  func.func @transform_3(%arg0: i32) -> (i32, i32, i32) {
    %c0_i32 = arith.constant 0 : i32
    %c0_i32_0 = arith.constant 0 : i32
    %c0_i32_1 = arith.constant 0 : i32
    return %arg0, %c0_i32, %c0_i32_0 : i32, i32, i32
  }
}

</mosaic_0001>

<bundles_post_ra>
// kernel: tpu_custom_call.1
= control target key start
LH: loop header
LB: loop body
LE: loop exit
PB: predicated region body
PF: predicated region fallthrough
CT: control target
= control target key end

     0   :  { %9 = vsyncpa [#allocation3], 0  ;;  %s7866_s0 = inlined_call_operand.vmem [shape: bf16[2,328,4], index: 0, kind: input, shape index: {}]   ;;  %s7867_s1 = inlined_call_operand.vmem [shape: bf16[9,4,128], index: 1, kind: input, shape index: {}]   ;;  %s7868_s2 = inlined_call_operand.hbm [shape: f32[512,128], index: 2, kind: output, shape index: {0}]   ;;  %s7869_s3 = inlined_call_operand.hbm [shape: f32[2,2,128], index: 3, kind: output, shape index: {1}]  }
   0x1   :  { %11 = vsyncpa [#allocation3 + $0x1], 0 }
   0x2   :  { %12 = vsyncpa [#allocation5], 0 }
   0x3   :  { %14 = vsyncpa [#allocation5 + $0x1], 0  ;;  %s5346_s12 = smov 0   ;;  %s5348_s13 = smov 0  }
   0x4   :  { %s5350_s14 = smov 0   ;;  %s5352_s15 = smov 0  }
   0x5 LB: > { %s5367_s16 = sadd.s32 4294967295, %s5320_s15   ;;  %s4063_s17 = sadd.s32 4294967294, %s5320_s15   ;;  %s5320_s15 = sphi %s5352_s15, %s8307_s15   ;;  %s5316_s14 = sphi %s5350_s14, %s8306_s14   ;;  %s5312_s13 = sphi %s5348_s13, %s8305_s13   ;;  %s5308_s12 = sphi %s5346_s12, %s8304_s12  }
   0x6   : > { %s5371_s18 = sadd.s32 1, %s5320_s15   ;;  %s74_s19 = sadd.s32 1, %s5316_s14 }
   0x7   : > { %s71_s20 = ssub.s32 %s5320_s15, %s5371_s18  ;;  %p84_p0 = scmp.ne.s32.totalorder %s5316_s14, %s5312_s13 }
   0x8   : > { %p72_p1 = scmp.eq.s32.totalorder %s71_s20, 0  ;;  %p85_p2 = scmp.eq.s32.totalorder %s5367_s16, 1 }
   0x9   : > { %p90_p3 = scmp.ne.s32.totalorder %s5312_s13, %s5308_s12  ;;  %p91_p4 = scmp.eq.s32.totalorder %s4063_s17, 1 }
   0xa   : > { %s5382_s21 = scalar_select %p72_p1, %s5316_s14, %s74_s19  }
   0xb   : > { %p5384_p5 = por %p85_p2, %p84_p0  ;;  %p5388_p6 = por %p91_p4, %p90_p3 }
   0xc   : > { %p4066_p7 = scmp.ge.s32.totalorder %s5320_s15, 1  ;;  %p146_p8 = scmp.lt.s32.totalorder %s5320_s15, 3 }
   0xe   : > { %p147_p9 = pnand %p4066_p7, %p146_p8 }
  0x10   : > { %150 = sbr.rel (%p147_p9) target bundleno = 639 (0x27f), region = 28 }
  0x17   : > { %vm490_vm0 = vcmask 1041408   ;;  %v5397_v0 = vld [vmem:[%s7867_s1 + $0x8] sm:$0x3]  ;;  %v4089_v1 = vld [vmem:[%s7867_s1 + $0x2] sm:$0x3]  ;;  %p175_p10 = scmp.lt.s32.totalorder %s5367_s16, 1 }
  0x18   : > { %5078 = vmatprep.subr.msk.bf16.mxu0 %vm490_vm0, %v5397_v0  ;;  %5074 = vmatprep.subr.msk.bf16.mxu1 %vm490_vm0, %v4089_v1  ;;  %v5408_v2 = vsel %vm490_vm0, %v5397_v0, 0  ;;  %v492_v3 = vsel %vm490_vm0, %v4089_v1, 0  ;;  %v4185_v4 = vld [vmem:[%s7867_s1 + $0xa] sm:$0x3]  ;;  %v282_v5 = vld [vmem:[%s7867_s1] sm:$0x3] }
  0x19   : > { %7952 = vst [vmem:[#allocation8_spill] sm:$0xff] %v5408_v2  ;;  %4595 = vmatpush3.bf16.msra.mxu0 %v5408_v2  ;;  %4443 = vmatpush3.bf16.msra.mxu1 %v492_v3  ;;  %s176_s28 = scalar_select %p175_p10, %s5367_s16, 1  ;;  %vm286_vm1 = vsmask.f32 7424  ;;  %vm1450_vm2 = vsmask.f32 6400 }
  0x1a   : > { %5080 = vmatprep.subr.msk.bf16.mxu0 %vm490_vm0, %v4185_v4  ;;  %5075 = vmatprep.subr.msk.bf16.mxu1 %vm490_vm0, %v282_v5  ;;  %vm435_vm3 = vcmask 31744   ;;  %v1901_v8 = vsel %vm490_vm0, %v4185_v4, 0  ;;  %v708_v10 = vsel %vm490_vm0, %v282_v5, 0  ;;  %v5471_v36 = vld [vmem:[%s7867_s1 + $0x4] sm:$0x3]  ;;  %vm1808_vm4 = vcmask 1045504  }
  0x1b   : > { %s5084_s6 = smul.u32 164, %s176_s28  ;;  %v5502_v51 = vld [vmem:[%s7867_s1 + $0xc] sm:$0x3]  ;;  %vm2350_vm5 = vsmask.f32 5376  ;;  %vm908_vm6 = vcmask 1046528  }
  0x1c   : > { %vm2708_vm7 = vcmask 1044480   ;;  %s6896_s29 = sand.u32 1, %s5312_s13   ;;  %s4270_s5 = sshll.u32 %s5367_s16, 12 }
  0x1d   : > { %s5424_s9 = scalar_lea.vmem %s7866_s0, %s5084_s6  ;;  %s4067_s30 = sshll.u32 %s6896_s29, 8 }
  0x1e   : > { %v5427_v6 = vld [vmem:[%s5424_s9] sm:$0xff]   ;;  %v5430_v7 = vld [vmem:[%s5424_s9 + $0x8] sm:$0xff]   ;;  %v5434_v9 = vld [vmem:[%s5424_s9 + $0x10] sm:$0xff]   ;;  %s7078_s4 = scalar_lea.vmem [#allocation2], %s4067_s30  ;;  %s3938_s10 = scalar_lea.sflag [#allocation3], %s6896_s29 }
  0x1f   : > { %v288_v11 = vshrl.u32 %v5427_v6, 16  ;;  %v290_v12 = vshll.u32 %v5427_v6, 16  ;;  %v295_v13 = vshll.u32 %v5430_v7, 16  ;;  %v299_v14 = vshrl.u32 %v5430_v7, 16  ;;  %v5448_v17 = vld [vmem:[%s5424_s9 + $0x18] sm:$0xff]   ;;  %v5451_v18 = vld [vmem:[%s5424_s9 + $0x20] sm:$0xff]  }
  0x20   : > { %v5442_v15 = vshll.u32 %v5434_v9, 16  ;;  %v5445_v16 = vshrl.u32 %v5434_v9, 16  ;;  %v5457_v26 = vshll.u32 %v5448_v17, 16  ;;  %v5460_v30 = vshrl.u32 %v5448_v17, 16  ;;  %v5463_v31 = vld [vmem:[%s5424_s9 + $0x28] sm:$0xff]   ;;  %v5480_v41 = vld [vmem:[%s5424_s9 + $0x30] sm:$0xff]  }
  0x21   : > { %v292_v19 = vrot.slane %v290_v12, 1  ;;  %v297_v20 = vrot.slane %v295_v13, 1  ;;  %v1451_v21 = vrot.slane %v299_v14, 1  ;;  %v1452_v22 = vrot.slane %v295_v13, 2  ;;  %v5497_v50 = vld [vmem:[%s5424_s9 + $0x38] sm:$0xff]   ;;  %v5525_v63 = vld [vmem:[%s5424_s9 + $0x40] sm:$0xff]  }
  0x22   : > { %v1454_v23 = vrot.slane %v5445_v16, 1  ;;  %v1455_v24 = vrot.slane %v5442_v15, 2  ;;  %v305_v25 = vrot.slane %v5442_v15, 1  ;;  %v1459_v33 = vrot.slane %v5457_v26, 2  ;;  %s3956_s6 = sshll.u32 %s7078_s4, 4  ;;  %s5322_s17 = smov [#allocation2]   ;;  %s7775_s6 = int_to_ptr.vmem [resolvable:$true] %s3956_s6 }
  0x23   : > { %v293_v27 = vor.u32 %v292_v19, %v288_v11  ;;  %v301_v28 = vor.u32 %v299_v14, %v297_v20  ;;  %v1453_v29 = vor.u32 %v1452_v22, %v1451_v21  ;;  %v313_v35 = vrot.slane %v5457_v26, 1  ;;  %s5226_s11 = scalar_lea.vmem %s7775_s6, 4096  ;;  %s5230_s19 = sshll.u32 %s5322_s17, 4  ;;  %s5231_s19 = int_to_ptr.vmem [resolvable:$false] %s5230_s19 }
  0x24   : > { %v1456_v32 = vor.u32 %v1455_v24, %v1454_v23  ;;  %v309_v34 = vor.u32 %v5445_v16, %v305_v25  ;;  %v1458_v39 = vrot.slane %v5460_v30, 1  ;;  %v5477_v40 = vshll.u32 %v5451_v18, 16  ;;  %v5552_v23 = vld [vmem:[%s5424_s9 + $0x48] sm:$0xff]   ;;  %p5227_p11 = scmp.ne.s32.totalorder %s7775_s6, %s5226_s11  ;;  %s5232_s20 = scalar_lea.vmem %s5231_s19, 8192 }
  0x25   : > { %v298_v37 = vsel %vm286_vm1, %v293_v27, %v297_v20  ;;  %v306_v38 = vsel %vm286_vm1, %v301_v28, %v305_v25  ;;  %v5486_v44 = vshrl.u32 %v5451_v18, 16  ;;  %v317_v45 = vor.u32 %v5460_v30, %v313_v35  ;;  %v5559_v28 = vld [vmem:[%s5424_s9 + $0x50] sm:$0xff]   ;;  %p5233_p0 = scmp.lt.s32.totalorder %s7775_s6, %s5231_s19  ;;  %p5234_p1 = scmp.lt.s32.totalorder %s5232_s20, %s5226_s11 }
  0x26   : > { %4444 = vmatprep.mubr.msk.bf16.mxu1 %vm435_vm3, %v298_v37  ;;  %v1457_v42 = vsel %vm1450_vm2, %v1453_v29, %v1456_v32  ;;  %v314_v43 = vsel %vm286_vm1, %v309_v34, %v313_v35  ;;  %v1460_v46 = vor.u32 %v1459_v33, %v1458_v39  ;;  %v1463_v47 = vrot.slane %v5477_v40, 2  ;;  %p5228_p12 = pnand %p5227_p11, %p5384_p5 }
  0x27   : > { %4596 = vmatprep.mubr.msk.bf16.mxu0 %vm435_vm3, %v1457_v42  ;;  %4445 = vmatmul.mubr.msk.bf16.vlgmr.msra.gmra.mrb[0].mxu1 %vm435_vm3, %v306_v38  ;;  %v321_v48 = vrot.slane %v5477_v40, 1  ;;  %v5494_v49 = vshll.u32 %v5463_v31, 16  ;;  %v1462_v52 = vrot.slane %v5486_v44, 1  ;;  %v5507_v53 = vshrl.u32 %v5463_v31, 16  ;;  %p5235_p2 = por %p5234_p1, %p5233_p0 }
  0x28   : > { %4448 = vmatprep.mubr.msk.bf16.mxu1 %vm435_vm3, %v314_v43  ;;  %4481 = vmatpush3.bf16.msra.mxu1 %v708_v10  ;;  %v5510_v54 = vshll.u32 %v5480_v41, 16  ;;  %v5513_v55 = vshrl.u32 %v5480_v41, 16  ;;  %v1461_v56 = vsel %vm1450_vm2, %v1456_v32, %v1460_v46  ;;  %v5529_v3 = vshll.u32 %v5497_v50, 16  ;;  %p5229_p13 = pneg %p5228_p12 }
  0x29   : > { %v1467_v57 = vrot.slane %v5494_v49, 2  ;;  %v325_v58 = vor.u32 %v5486_v44, %v321_v48  ;;  %5076 = vmatprep.subr.msk.bf16.mxu1 %vm490_vm0, %v5471_v36  ;;  %4597 = vmatmul.mubr.msk.bf16.vlgmr.msra.gmra.mrb[0].mxu0 %vm435_vm3, %v1461_v56  ;;  %v1464_v59 = vor.u32 %v1463_v47, %v1462_v52  ;;  %v1466_v60 = vrot.slane %v5507_v53, 1  ;;  %v5586_v56 = vld [vmem:[%s5424_s9 + $0x58] sm:$0xff]  }
  0x2a   : > { %v329_v61 = vrot.slane %v5494_v49, 1  ;;  %v1470_v62 = vrot.slane %v5513_v55, 1  ;;  %4633 = vmatpush3.bf16.msra.mxu0 %v1901_v8  ;;  %v1471_v1 = vrot.slane %v5510_v54, 2  ;;  %v5532_v4 = vshrl.u32 %v5497_v50, 16  ;;  %p5236_p3 = pnand %p5235_p2, %p5229_p13 }
  0x2b   : > { %v1465_v5 = vsel %vm1450_vm2, %v1460_v46, %v1464_v59  ;;  %v322_v10 = vsel %vm286_vm1, %v317_v45, %v321_v48  ;;  %v1468_v11 = vor.u32 %v1467_v57, %v1466_v60  ;;  %5081 = vmatprep.subr.msk.bf16.mxu0 %vm490_vm0, %v5502_v51  ;;  %v337_v13 = vrot.slane %v5510_v54, 1 }
  0x2c   : > { %4600 = vmatprep.mubr.msk.bf16.mxu0 %vm435_vm3, %v1465_v5  ;;  %v330_v8 = vsel %vm286_vm1, %v325_v58, %v329_v61  ;;  %v1472_v12 = vor.u32 %v1471_v1, %v1470_v62  ;;  %v5542_v14 = vshll.u32 %v5525_v63, 16  ;;  %v1474_v20 = vrot.slane %v5532_v4, 1 }
  0x2d   : > { %v1469_v19 = vsel %vm1450_vm2, %v1464_v59, %v1468_v11  ;;  %v1475_v21 = vrot.slane %v5529_v3, 2  ;;  %v5549_v22 = vshrl.u32 %v5525_v63, 16  ;;  %v333_v25 = vor.u32 %v5507_v53, %v329_v61 }
  0x2e   : > { %v1473_v24 = vsel %vm1450_vm2, %v1468_v11, %v1472_v12  ;;  %v1479_v27 = vrot.slane %v5542_v14, 2  ;;  %v341_v29 = vor.u32 %v5513_v55, %v337_v13  ;;  %v345_v32 = vrot.slane %v5529_v3, 1 }
  0x2f   : > { %4449 = vmatmul.mubr.msk.bf16.gmra.mrb[4].mxu1 %vm435_vm3, %v322_v10  ;;  %v1478_v33 = vrot.slane %v5549_v22, 1  ;;  %v1476_v34 = vor.u32 %v1475_v21, %v1474_v20  ;;  %v5567_v35 = vshll.u32 %v5552_v23, 16  ;;  %v5570_v37 = vshrl.u32 %v5552_v23, 16 }
  0x30   : > { %4452 = vmatprep.mubr.msk.bf16.mxu1 %vm435_vm3, %v330_v8  ;;  %v338_v38 = vsel %vm286_vm1, %v333_v25, %v337_v13  ;;  %v5574_v42 = vshll.u32 %v5559_v28, 16  ;;  %v5577_v43 = vshrl.u32 %v5559_v28, 16  ;;  %v346_v45 = vsel %vm286_vm1, %v341_v29, %v345_v32  ;;  %v5606_v13 = vld [vmem:[%s5424_s9 + $0x88] sm:$0xff]   ;;  %v5614_v25 = vld [vmem:[%s5424_s9 + $0x60] sm:$0xff]  }
  0x31   : > { %4601 = vmatmul.mubr.msk.bf16.gmra.mrb[4].mxu0 %vm435_vm3, %v1469_v19  ;;  %v1480_v39 = vor.u32 %v1479_v27, %v1478_v33  ;;  %v1477_v46 = vsel %vm1450_vm2, %v1472_v12, %v1476_v34  ;;  %v353_v47 = vrot.slane %v5542_v14, 1  ;;  %v1482_v48 = vrot.slane %v5570_v37, 1  ;;  %v218_v27 = vld [vmem:[%s5424_s9 + $0x90] sm:$0xf] }
  0x32   : > { %4604 = vmatprep.mubr.msk.bf16.mxu0 %vm435_vm3, %v1473_v24  ;;  %v1483_v52 = vrot.slane %v5567_v35, 2  ;;  %v349_v58 = vor.u32 %v5532_v4, %v345_v32  ;;  %v1486_v59 = vrot.slane %v5577_v43, 1  ;;  %v1487_v60 = vrot.slane %v5574_v42, 2 }
  0x33   : > { %v1481_v57 = vsel %vm1450_vm2, %v1476_v34, %v1480_v39  ;;  %v357_v61 = vor.u32 %v5549_v22, %v353_v47  ;;  %v361_v62 = vrot.slane %v5567_v35, 1  ;;  %v5598_v5 = vshll.u32 %v5586_v56, 16 }
  0x34   : > { %v1484_v1 = vor.u32 %v1483_v52, %v1482_v48  ;;  %v5601_v10 = vshrl.u32 %v5586_v56, 16  ;;  %v354_v11 = vsel %vm286_vm1, %v349_v58, %v353_v47  ;;  %v1488_v8 = vor.u32 %v1487_v60, %v1486_v59 }
  0x35   : > { %7953 = vst [vmem:[#allocation9_spill] sm:$0xff] %v5598_v5  ;;  %v362_v12 = vsel %vm286_vm1, %v357_v61, %v361_v62  ;;  %v369_v20 = vrot.slane %v5574_v42, 1  ;;  %v1491_v24 = vrot.slane %v5598_v5, 2  ;;  %v365_v32 = vor.u32 %v5570_v37, %v361_v62 }
  0x36   : > { %7954 = vst [vmem:[#allocation10_spill] sm:$0xff] %v5601_v10  ;;  %v1485_v19 = vsel %vm1450_vm2, %v1480_v39, %v1484_v1  ;;  %v1490_v21 = vrot.slane %v5601_v10, 1  ;;  %v1489_v29 = vsel %vm1450_vm2, %v1484_v1, %v1488_v8  ;;  %v377_v34 = vrot.slane %v5598_v5, 1 }
  0x37   : > { %4453 = vmatmul.mubr.msk.bf16.gmra.mrb[8].mxu1 %vm435_vm3, %v338_v38  ;;  %v373_v33 = vor.u32 %v5577_v43, %v369_v20  ;;  %v5623_v38 = vld [vmem:[%s5424_s9 + $0x68] sm:$0xff]   ;;  %v5626_v39 = vshll.u32 %v5606_v13, 16  ;;  %v5638_v48 = vshll.u32 %v5614_v25, 16  ;;  %v1809_v58 = vrot.slane %v5430_v7, 2 }
  0x38   : > { %4456 = vmatprep.mubr.msk.bf16.mxu1 %vm435_vm3, %v346_v45  ;;  %v5629_v45 = vcombine.low %v218_v27, %v218_v27  ;;  %v5635_v47 = vor.u32 %v1491_v24, %v1490_v21  ;;  %v1810_v59 = vrot.slane %v5434_v9, 2  ;;  %v5647_v62 = vshrl.u32 %v5614_v25, 16  ;;  %v5660_v21 = vld [vmem:[%s5424_s9 + $0x70] sm:$0xff]  }
  0x39   : > { %4605 = vmatmul.mubr.msk.bf16.gmra.mrb[8].mxu0 %vm435_vm3, %v1477_v46  ;;  %v5632_v46 = vshrl.u32 %v5606_v13, 16  ;;  %7958 = vst [vmem:[#allocation14_spill] sm:$0xff] %v5638_v48  ;;  %v7870_v52 = vrot.slane %v5626_v39, 1  ;;  %v378_v61 = vsel %vm286_vm1, %v373_v33, %v377_v34  ;;  %v5650_v1 = vshll.u32 %v5623_v38, 16 }
  0x3a   : > { %4608 = vmatprep.mubr.msk.bf16.mxu0 %vm435_vm3, %v1481_v57  ;;  %7955 = vst [vmem:[#allocation11_spill] sm:$0xff] %v5629_v45  ;;  %7957 = vst [vmem:[#allocation13_spill] sm:$0xff] %v5635_v47  ;;  %v370_v57 = vsel %vm286_vm1, %v365_v32, %v369_v20  ;;  %v431_v60 = vshll.u32 %v5629_v45, 16  ;;  %v385_v20 = vrot.slane %v5638_v48, 1  ;;  %v1811_v24 = vsel %vm1808_vm4, %v1809_v58, %v1810_v59 }
  0x3b   : > { %7956 = vst [vmem:[#allocation12_spill] sm:$0xff] %v5632_v46  ;;  %7959 = vst [vmem:[#allocation15_spill] sm:$0xff] %v5647_v62  ;;  %v5677_v58 = vshll.u32 %v5660_v21, 16  ;;  %v7969_v5 = vrot.slane %v5626_v39, 1  ;;  %v2359_v45 = vrot.slane %v5477_v40, 3  ;;  %v1824_v40 = vrot.slane %v5552_v23, 2 }
  0x3c   : > { %7960 = vst [vmem:[#allocation16_spill] sm:$0xff] %v5650_v1  ;;  %v389_v33 = vor.u32 %v5647_v62, %v385_v20 }
  0x3d   : > { %7961 = vst [vmem:[#allocation17_spill] sm:$0xff] %v5677_v58 }
  0x3f   : > { %4457 = vmatmul.mubr.msk.bf16.gmra.mrb[12].mxu1 %vm435_vm3, %v354_v11  ;;  %v429_v11 = vor.u32 %v5632_v46, %v7870_v52  ;;  %v5686_v52 = vshrl.u32 %v5660_v21, 16 }
  0x40   : > { %4460 = vmatprep.mubr.msk.bf16.mxu1 %vm435_vm3, %v362_v12  ;;  %v433_v12 = vrot.slane %v431_v60, 1  ;;  %v1812_v60 = vrot.slane %v5448_v17, 2 }
  0x41   : > { %4609 = vmatmul.mubr.msk.bf16.gmra.mrb[12].mxu0 %vm435_vm3, %v1485_v19  ;;  %v1493_v19 = vsel %vm1450_vm2, %v1488_v8, %v5635_v47  ;;  %v5671_v8 = vld [vmem:[%s5424_s9 + $0x78] sm:$0xff]   ;;  %7963 = vst [vmem:[#allocation19_spill] sm:$0xff] %v5686_v52  ;;  %v5698_v47 = vld [vmem:[%s5424_s9 + $0x80] sm:$0xff]  }
  0x42   : > { %4612 = vmatprep.mubr.msk.bf16.mxu0 %vm435_vm3, %v1489_v29  ;;  %v381_v29 = vor.u32 %v5601_v10, %v377_v34  ;;  %v5666_v32 = vsel %vm286_vm1, %v429_v11, %v433_v12  ;;  %v5682_v11 = vshrl.u32 %v5623_v38, 16  ;;  %v2358_v10 = vrot.slane %v5486_v44, 2 }
  0x43   : > { %v2362_v44 = vrot.slane %v5507_v53, 2 }
  0x44   : > { %v386_v34 = vsel %vm286_vm1, %v381_v29, %v385_v20  ;;  %7962 = vst [vmem:[#allocation18_spill] sm:$0xff] %v5682_v11  ;;  %v5694_v20 = vsel %vm1808_vm4, %v1810_v59, %v1812_v60  ;;  %v401_v29 = vrot.slane %v5677_v58, 1  ;;  %v5714_v58 = vld [vmem:[%s7867_s1 + $0xe] sm:$0x3] }
  0x47   : > { %4461 = vmatmul.mubr.msk.bf16.gmra.mrb[16].mxu1 %vm435_vm3, %v370_v57  ;;  %v393_v57 = vrot.slane %v5650_v1, 1  ;;  %v405_v1 = vor.u32 %v5686_v52, %v401_v29  ;;  %v5734_v52 = vshrl.u32 %v5671_v8, 16 }
  0x48   : > { %4464 = vmatprep.mubr.msk.bf16.mxu1 %vm435_vm3, %v378_v61  ;;  %v1814_v61 = vrot.slane %v5451_v18, 2 }
  0x49   : > { %4613 = vmatmul.mubr.msk.bf16.gmra.mrb[16].mxu0 %vm435_vm3, %v1493_v19  ;;  %v394_v12 = vsel %vm286_vm1, %v389_v33, %v393_v57  ;;  %v5689_v19 = vshll.u32 %v5671_v8, 16  ;;  %v2133_v33 = vsel %vm490_vm0, %v5502_v51, 0  ;;  %v397_v2 = vor.u32 %v5682_v11, %v393_v57  ;;  %v5719_v51 = vld [vmem:[%s5424_s9 + $0x98] sm:$0xf]  ;;  %7967 = vst [vmem:[#allocation23_spill] sm:$0xff] %v5734_v52 }
  0x4a   : > { %4634 = vmatprep.mubr.msk.bf16.mxu0 %vm435_vm3, %v1811_v24  ;;  %v219_v24 = vld [vmem:[%s5424_s9 + $0x94] sm:$0xf]  ;;  %v5704_v46 = vsel %vm1808_vm4, %v1812_v60, %v1814_v61  ;;  %v221_v60 = vld [vmem:[%s5424_s9 + $0x9c] sm:$0xf]  ;;  %v1816_v57 = vrot.slane %v5463_v31, 2  ;;  %v5740_v11 = vshrl.u32 %v5698_v47, 16 }
  0x4b   : > { %7964 = vst [vmem:[#allocation20_spill] sm:$0xff] %v5689_v19  ;;  %v5709_v59 = vcombine.low %v218_v27, %v219_v24  ;;  %v5726_v27 = vshll.u32 %v5698_v47, 16  ;;  %v402_v24 = vsel %vm286_vm1, %v397_v2, %v401_v29 }
  0x4c   : > { %7968 = vst [vmem:[#allocation24_spill] sm:$0xff] %v5740_v11  ;;  %v5748_v2 = vsel %vm1808_vm4, %v1814_v61, %v1816_v57  ;;  %v2351_v61 = vrot.slane %v5445_v16, 2 }
  0x4d   : > { %7965 = vst [vmem:[#allocation21_spill] sm:$0xff] %v5709_v59  ;;  %7966 = vst [vmem:[#allocation22_spill] sm:$0xff] %v5726_v27  ;;  %v5743_v48 = vrot.slane %v5709_v59, 2  ;;  %v417_v29 = vrot.slane %v5726_v27, 1  ;;  %v2352_v27 = vrot.slane %v5442_v15, 3 }
  0x4f   : > { %4465 = vmatmul.mubr.msk.bf16.gmra.mrb[20].mxu1 %vm435_vm3, %v386_v34  ;;  %v409_v34 = vrot.slane %v5689_v19, 1  ;;  %v1818_v19 = vrot.slane %v5480_v41, 2 }
  0x50   : > { %4468 = vmatprep.mubr.msk.bf16.mxu1 %vm435_vm3, %v394_v12  ;;  %v5729_v12 = vcombine.low %v5719_v51, %v221_v60 }
  0x51   : > { %4635 = vmatmul.mubr.msk.bf16.vlgmr.msra.gmra.mrb[0].mxu0 %vm435_vm3, %v5694_v20  ;;  %v5759_v59 = vsel %vm1808_vm4, %v1816_v57, %v1818_v19  ;;  %v413_v62 = vor.u32 %v5734_v52, %v409_v34  ;;  %v2355_v57 = vrot.slane %v5457_v26, 3  ;;  %v2353_v52 = vor.u32 %v2352_v27, %v2351_v61 }
  0x52   : > { %4671 = vmatpush3.bf16.msra.mxu0 %v2133_v33  ;;  %4638 = vmatprep.mubr.msk.bf16.mxu0 %vm435_vm3, %v5704_v46  ;;  %v410_v33 = vsel %vm286_vm1, %v405_v1, %v409_v34  ;;  %v7893_v60 = vrot.slane %v5729_v12, 2  ;;  %v1830_v61 = vrot.slane %v5614_v25, 2 }
  0x53   : > { %5082 = vmatprep.subr.msk.bf16.mxu0 %vm490_vm0, %v5714_v58  ;;  %v418_v34 = vsel %vm286_vm1, %v413_v62, %v417_v29  ;;  %v2360_v62 = vor.u32 %v2359_v45, %v2358_v10  ;;  %v2363_v10 = vrot.slane %v5494_v49, 3  ;;  %v1826_v45 = vrot.slane %v5559_v28, 2 }
  0x54   : > { %v5755_v1 = vsel %vm1808_vm4, %v5743_v48, %v7893_v60  ;;  %v1820_v60 = vrot.slane %v5497_v50, 2 }
  0x55   : > { %v5814_v49 = vsel %vm1808_vm4, %v1824_v40, %v1826_v45 }
  0x57   : > { %4469 = vmatmul.mubr.msk.bf16.gmra.mrb[24].mxu1 %vm435_vm3, %v402_v24  ;;  %v421_v24 = vor.u32 %v5740_v11, %v417_v29  ;;  %v1822_v11 = vrot.slane %v5525_v63, 2 }
  0x58   : > { %4472 = vmatprep.mubr.msk.bf16.mxu1 %vm435_vm3, %v410_v33  ;;  %v2354_v33 = vrot.slane %v5460_v30, 2  ;;  %v5781_v30 = vsel %vm1808_vm4, %v1818_v19, %v1820_v60  ;;  %v2366_v19 = vrot.slane %v5513_v55, 2  ;;  %v2370_v55 = vrot.slane %v5532_v4, 2  ;;  %v5834_v4 = vld [vmem:[%s7867_s1 + $0x6] sm:$0x3] }
  0x59   : > { %4639 = vmatmul.mubr.msk.bf16.gmra.mrb[4].mxu0 %vm435_vm3, %v5748_v2  ;;  %v426_v16 = vsel %vm286_vm1, %v421_v24, %v7969_v5  ;;  %v5788_v27 = vsel %vm1808_vm4, %v1820_v60, %v1822_v11  ;;  %v2367_v60 = vrot.slane %v5510_v54, 3  ;;  %v5806_v29 = vsel %vm1808_vm4, %v1822_v11, %v1824_v40 }
  0x5a   : > { %4642 = vmatprep.mubr.msk.bf16.mxu0 %vm435_vm3, %v5759_v59  ;;  %v2356_v15 = vor.u32 %v2355_v57, %v2354_v33  ;;  %v1828_v11 = vrot.slane %v5586_v56, 2  ;;  %v1001_v57 = vsel %vm490_vm0, %v5471_v36, 0  ;;  %v2379_v40 = vrot.slane %v5567_v35, 3 }
  0x5b   : > { %v2368_v53 = vor.u32 %v2367_v60, %v2366_v19  ;;  %v2383_v19 = vrot.slane %v5574_v42, 3 }
  0x5c   : > { %v5784_v26 = vsel %vm2350_vm5, %v2353_v52, %v2356_v15  ;;  %v5791_v5 = vsel %vm2350_vm5, %v2356_v15, %v2360_v62  ;;  %v2364_v52 = vor.u32 %v2363_v10, %v2362_v44  ;;  %v5842_v15 = vsel %vm1808_vm4, %v1826_v45, %v1828_v11 }
  0x5d   : > { %v5847_v36 = vsel %vm1808_vm4, %v1828_v11, %v1830_v61  ;;  %v1832_v44 = vrot.slane %v5623_v38, 2  ;;  %v1834_v10 = vrot.slane %v5660_v21, 2 }
  0x5e   : > { %v5809_v24 = vsel %vm2350_vm5, %v2360_v62, %v2364_v52  ;;  %v5819_v54 = vsel %vm2350_vm5, %v2364_v52, %v2368_v53  ;;  %v2382_v52 = vrot.slane %v5577_v43, 2  ;;  %v1836_v43 = vrot.slane %v5671_v8, 2 }
  0x5f   : > { %4473 = vmatmul.mubr.msk.bf16.gmra.mrb[28].mxu1 %vm435_vm3, %v418_v34  ;;  %v2374_v34 = vrot.slane %v5549_v22, 2  ;;  %v2378_v22 = vrot.slane %v5570_v37, 2  ;;  %v5870_v35 = vsel %vm1808_vm4, %v1830_v61, %v1832_v44  ;;  %v1840_v61 = vrot.slane %v5606_v13, 2 }
  0x60   : > { %4476 = vmatprep.mubr.msk.bf16.mxu1 %vm435_vm3, %v426_v16  ;;  %v2375_v16 = vrot.slane %v5542_v14, 3  ;;  %v5872_v37 = vor.u32 %v2383_v19, %v2382_v52  ;;  %v6039_v52 = vld [vmem:[%s5424_s9 + $0xa0] ss:$0 sps:$4 sm:$0xff]   ;;  %v928_v19 = vrot.slane %v5559_v28, 1  ;;  %s7773_s9 = scalar_lea.hbm %s7868_s2, %s4270_s5 }
  0x61   : > { %4643 = vmatmul.mubr.msk.bf16.gmra.mrb[8].mxu0 %vm435_vm3, %v5781_v30  ;;  %v2380_v45 = vor.u32 %v2379_v40, %v2378_v22  ;;  %v924_v40 = vrot.slane %v5525_v63, 1 }
  0x62   : > { %4646 = vmatprep.mubr.msk.bf16.mxu0 %vm435_vm3, %v5788_v27  ;;  %v2376_v62 = vor.u32 %v2375_v16, %v2374_v34  ;;  %v5917_v34 = vsel %vm1808_vm4, %v1840_v61, %v5743_v48 }
  0x63   : > { %v5881_v42 = vsel %vm2350_vm5, %v2380_v45, %v5872_v37 }
  0x64   : > { %v5865_v60 = vsel %vm2350_vm5, %v2376_v62, %v2380_v45 }
  0x67   : > { %4477 = vmatmul.mubr.msk.bf16.gmra.mrb[32].mxu1 %vm435_vm3, %v5666_v32  ;;  %v2371_v32 = vrot.slane %v5529_v3, 3 }
  0x68   : > { %4482 = vmatprep.mubr.msk.bf16.mxu1 %vm435_vm3, %v5427_v6 }
  0x69   : > { %4647 = vmatmul.mubr.msk.bf16.gmra.mrb[12].mxu0 %vm435_vm3, %v5806_v29  ;;  %v2372_v33 = vor.u32 %v2371_v32, %v2370_v55  ;;  %v1838_v55 = vrot.slane %v5698_v47, 2  ;;  %v5892_v32 = vsel %vm1808_vm4, %v1834_v10, %v1836_v43 }
  0x6a   : > { %4650 = vmatprep.mubr.msk.bf16.mxu0 %vm435_vm3, %v5814_v49 }
  0x6b   : > { %v5837_v3 = vsel %vm2350_vm5, %v2368_v53, %v2372_v33  ;;  %v5852_v14 = vsel %vm2350_vm5, %v2372_v33, %v2376_v62  ;;  %v5877_v53 = vsel %vm1808_vm4, %v1832_v44, %v1834_v10  ;;  %v5897_v11 = vsel %vm1808_vm4, %v1836_v43, %v1838_v55 }
  0x6c   : > { %v5907_v33 = vsel %vm1808_vm4, %v1838_v55, %v1840_v61  ;;  %v2491_v62 = vsel %vm490_vm0, %v5714_v58, 0  ;;  %v910_v58 = vrot.slane %v5430_v7, 1  ;;  %v926_v44 = vrot.slane %v5552_v23, 1 }
  0x6d   : > { %v934_v61 = vrot.slane %v5623_v38, 1 }
  0x6e   : > { %v6034_v45 = vsel %vm908_vm6, %v924_v40, %v926_v44  ;;  %v6051_v43 = vsel %vm908_vm6, %v926_v44, %v928_v19 }
  0x6f   : > { %4483 = vmatmul.mubr.msk.bf16.vlgmr.msra.gmra.mrb[0].mxu1 %vm435_vm3, %v5430_v7 }
  0x70   : > { %4486 = vmatprep.mubr.msk.bf16.mxu1 %vm435_vm3, %v5434_v9  ;;  %4519 = vmatpush3.bf16.msra.mxu1 %v1001_v57  ;;  %v5911_v57 = vcombine.low %v5719_v51, %v5719_v51 }
  0x71   : > { %5077 = vmatprep.subr.msk.bf16.mxu1 %vm490_vm0, %v5834_v4  ;;  %4651 = vmatmul.mubr.msk.bf16.gmra.mrb[16].mxu0 %vm435_vm3, %v5842_v15 }
  0x72   : > { %4654 = vmatprep.mubr.msk.bf16.mxu0 %vm435_vm3, %v5847_v36  ;;  %v1844_v16 = vrot.slane %v5911_v57, 2 }
  0x74   : > { %v1845_v51 = vsel %vm1808_vm4, %v5743_v48, %v1844_v16  ;;  %v5942_v48 = vld [vmem:[%s7867_s1 + $0x10] sm:$0x3] }
  0x75   : > { %v2801_v16 = vsel %vm490_vm0, %v5942_v48, 0 }
  0x77   : > { %4487 = vmatmul.mubr.msk.bf16.gmra.mrb[4].mxu1 %vm435_vm3, %v5448_v17 }
  0x78   : > { %4490 = vmatprep.mubr.msk.bf16.mxu1 %vm435_vm3, %v5451_v18 }
  0x79   : > { %4655 = vmatmul.mubr.msk.bf16.gmra.mrb[20].mxu0 %vm435_vm3, %v5870_v35 }
  0x7a   : > { %4658 = vmatprep.mubr.msk.bf16.mxu0 %vm435_vm3, %v5877_v53 }
  0x7f   : > { %4491 = vmatmul.mubr.msk.bf16.gmra.mrb[8].mxu1 %vm435_vm3, %v5463_v31 }
  0x80   : > { %4494 = vmatprep.mubr.msk.bf16.mxu1 %vm435_vm3, %v5480_v41 }
  0x81   : > { %4659 = vmatmul.mubr.msk.bf16.gmra.mrb[24].mxu0 %vm435_vm3, %v5892_v32 }
  0x82   : > { %4662 = vmatprep.mubr.msk.bf16.mxu0 %vm435_vm3, %v5897_v11 }
  0x87   : > { %4495 = vmatmul.mubr.msk.bf16.gmra.mrb[12].mxu1 %vm435_vm3, %v5497_v50 }
  0x88   : > { %4498 = vmatprep.mubr.msk.bf16.mxu1 %vm435_vm3, %v5525_v63 }
  0x89   : > { %4663 = vmatmul.mubr.msk.bf16.gmra.mrb[28].mxu0 %vm435_vm3, %v5907_v33 }
  0x8a   : > { %4666 = vmatprep.mubr.msk.bf16.mxu0 %vm435_vm3, %v5917_v34 }
  0x8f   : > { %4499 = vmatmul.mubr.msk.bf16.gmra.mrb[16].mxu1 %vm435_vm3, %v5552_v23 }
  0x90   : > { %4502 = vmatprep.mubr.msk.bf16.mxu1 %vm435_vm3, %v5559_v28 }
  0x91   : > { %4667 = vmatmul.mubr.msk.bf16.gmra.mrb[32].mxu0 %vm435_vm3, %v1845_v51  ;;  %v936_v51 = vrot.slane %v5660_v21, 1 }
  0x92   : > { %4672 = vmatprep.mubr.msk.bf16.mxu0 %vm435_vm3, %v5694_v20 }
  0x97   : > { %4503 = vmatmul.mubr.msk.bf16.gmra.mrb[20].mxu1 %vm435_vm3, %v5586_v56 }
  0x98   : > { %4506 = vmatprep.mubr.msk.bf16.mxu1 %vm435_vm3, %v5614_v25 }
  0x99   : > { %4673 = vmatmul.mubr.msk.bf16.vlgmr.msra.gmra.mrb[0].mxu0 %vm435_vm3, %v5704_v46  ;;  %v909_v46 = vrot.slane %v5427_v6, 1  ;;  %v914_v6 = vrot.slane %v5448_v17, 1 }
  0x9a   : > { %4709 = vmatpush3.bf16.msra.mxu0 %v2491_v62  ;;  %4676 = vmatprep.mubr.msk.bf16.mxu0 %vm435_vm3, %v5748_v2  ;;  %v938_v62 = vrot.slane %v5671_v8, 1 }
  0x9b   : > { %5083 = vmatprep.subr.msk.bf16.mxu0 %vm490_vm0, %v5942_v48  ;;  %v911_v20 = vsel %vm908_vm6, %v909_v46, %v910_v58  ;;  %v940_v48 = vrot.slane %v5698_v47, 1 }
  0x9c   : > { %v6090_v46 = vsel %vm908_vm6, %v936_v51, %v938_v62 }
  0x9f   : > { %4507 = vmatmul.mubr.msk.bf16.gmra.mrb[24].mxu1 %vm435_vm3, %v5623_v38 }
  0xa0   : > { %4510 = vmatprep.mubr.msk.bf16.mxu1 %vm435_vm3, %v5660_v21 }
  0xa1   : > { %4677 = vmatmul.mubr.msk.bf16.gmra.mrb[4].mxu0 %vm435_vm3, %v5759_v59  ;;  %v912_v59 = vrot.slane %v5434_v9, 1 }
  0xa2   : > { %4680 = vmatprep.mubr.msk.bf16.mxu0 %vm435_vm3, %v5781_v30  ;;  %v1233_v30 = vsel %vm490_vm0, %v5834_v4, 0 }
  0xa3   : > { %v5979_v7 = vsel %vm908_vm6, %v910_v58, %v912_v59  ;;  %v5982_v2 = vsel %vm908_vm6, %v912_v59, %v914_v6 }
  0xa7   : > { %4511 = vmatmul.mubr.msk.bf16.gmra.mrb[28].mxu1 %vm435_vm3, %v5671_v8 }
  0xa8   : > { %4514 = vmatprep.mubr.msk.bf16.mxu1 %vm435_vm3, %v5698_v47 }
  0xa9   : > { %4681 = vmatmul.mubr.msk.bf16.gmra.mrb[8].mxu0 %vm435_vm3, %v5788_v27  ;;  %v916_v27 = vrot.slane %v5451_v18, 1 }
  0xaa   : > { %4684 = vmatprep.mubr.msk.bf16.mxu0 %vm435_vm3, %v5806_v29  ;;  %v918_v29 = vrot.slane %v5463_v31, 1 }
  0xac   : > { %v6002_v4 = vsel %vm908_vm6, %v916_v27, %v918_v29 }
  0xaf   : > { %4515 = vmatmul.mubr.msk.bf16.gmra.mrb[32].mxu1 %vm435_vm3, %v5606_v13 }
  0xb0   : > { %4520 = vmatprep.mubr.msk.bf16.mxu1 %vm435_vm3, %v911_v20  ;;  %v7971_v20 = vld [vmem:[#allocation11_spill] sm:$0xff] }
  0xb1   : > { %4685 = vmatmul.mubr.msk.bf16.gmra.mrb[12].mxu0 %vm435_vm3, %v5814_v49  ;;  %v5999_v49 = vsel %vm908_vm6, %v914_v6, %v916_v27  ;;  %v944_v59 = vrot.slane %v7971_v20, 1  ;;  %v7972_v6 = vld [vmem:[#allocation10_spill] sm:$0xff]  ;;  %v7982_v20 = vld [vmem:[#allocation20_spill] sm:$0xff] }
  0xb2   : > { %4688 = vmatprep.mubr.msk.bf16.mxu0 %vm435_vm3, %v5842_v15  ;;  %v922_v15 = vrot.slane %v5497_v50, 1 }
  0xb4   : > { %v6031_v10 = vsel %vm908_vm6, %v922_v15, %v924_v40  ;;  %v7975_v40 = vld [vmem:[#allocation14_spill] sm:$0xff] }
  0xb5   : > { %v2391_v44 = vrot.slane %v7975_v40, 3 }
  0xb7   : > { %4521 = vmatmul.mubr.msk.bf16.vlgmr.msra.gmra.mrb[0].mxu1 %vm435_vm3, %v5979_v7 }
  0xb8   : > { %4524 = vmatprep.mubr.msk.bf16.mxu1 %vm435_vm3, %v5982_v2  ;;  %4557 = vmatpush3.bf16.msra.mxu1 %v1233_v30  ;;  %v7973_v30 = vld [vmem:[#allocation9_spill] sm:$0xff] }
  0xb9   : > { %5079 = vmatprep.subr.msk.bf16.mxu1 %vm490_vm0, %v5397_v0  ;;  %4689 = vmatmul.mubr.msk.bf16.gmra.mrb[16].mxu0 %vm435_vm3, %v5847_v36  ;;  %v920_v0 = vrot.slane %v5480_v41, 1  ;;  %v2387_v27 = vrot.slane %v7973_v30, 3 }
  0xba   : > { %4692 = vmatprep.mubr.msk.bf16.mxu0 %vm435_vm3, %v5870_v35  ;;  %v930_v35 = vrot.slane %v5586_v56, 1 }
  0xbb   : > { %v6015_v36 = vsel %vm908_vm6, %v918_v29, %v920_v0  ;;  %v6018_v22 = vsel %vm908_vm6, %v920_v0, %v922_v15  ;;  %v7974_v0 = vld [vmem:[#allocation15_spill] sm:$0xff] }
  0xbc   : > { %v6054_v55 = vsel %vm908_vm6, %v928_v19, %v930_v35  ;;  %v2390_v15 = vrot.slane %v7974_v0, 2 }
  0xbf   : > { %4525 = vmatmul.mubr.msk.bf16.gmra.mrb[4].mxu1 %vm435_vm3, %v5999_v49 }
  0xc0   : > { %4528 = vmatprep.mubr.msk.bf16.mxu1 %vm435_vm3, %v6002_v4 }
  0xc1   : > { %4693 = vmatmul.mubr.msk.bf16.gmra.mrb[20].mxu0 %vm435_vm3, %v5877_v53  ;;  %v2124_v53 = vrot.slane %v6039_v52, 2 }
  0xc2   : > { %4696 = vmatprep.mubr.msk.bf16.mxu0 %vm435_vm3, %v5892_v32  ;;  %v7970_v32 = vrot.slane %v5729_v12, 2 }
  0xc7   : > { %4529 = vmatmul.mubr.msk.bf16.gmra.mrb[8].mxu1 %vm435_vm3, %v6015_v36 }
  0xc8   : > { %4532 = vmatprep.mubr.msk.bf16.mxu1 %vm435_vm3, %v6018_v22 }
  0xc9   : > { %4697 = vmatmul.mubr.msk.bf16.gmra.mrb[24].mxu0 %vm435_vm3, %v5897_v11  ;;  %v2125_v11 = vsel %vm1808_vm4, %v7970_v32, %v2124_v53  ;;  %v7977_v53 = vld [vmem:[#allocation16_spill] sm:$0xff]  ;;  %v2392_v32 = vor.u32 %v2391_v44, %v2390_v15 }
  0xca   : > { %4700 = vmatprep.mubr.msk.bf16.mxu0 %vm435_vm3, %v5907_v33  ;;  %v7985_v15 = vld [vmem:[#allocation12_spill] sm:$0xff] }
  0xcb   : > { %v2410_v44 = vrot.slane %v7985_v15, 2 }
  0xcf   : > { %4533 = vmatmul.mubr.msk.bf16.gmra.mrb[12].mxu1 %vm435_vm3, %v6031_v10 }
  0xd0   : > { %4536 = vmatprep.mubr.msk.bf16.mxu1 %vm435_vm3, %v6034_v45 }
  0xd1   : > { %4701 = vmatmul.mubr.msk.bf16.gmra.mrb[28].mxu0 %vm435_vm3, %v5917_v34 }
  0xd2   : > { %4704 = vmatprep.mubr.msk.bf16.mxu0 %vm435_vm3, %v5755_v1  ;;  %v932_v1 = vrot.slane %v5614_v25, 1 }
  0xd4   : > { %v6069_v33 = vsel %vm908_vm6, %v930_v35, %v932_v1  ;;  %v6072_v34 = vsel %vm908_vm6, %v932_v1, %v934_v61 }
  0xd7   : > { %4537 = vmatmul.mubr.msk.bf16.gmra.mrb[16].mxu1 %vm435_vm3, %v6051_v43 }
  0xd8   : > { %4540 = vmatprep.mubr.msk.bf16.mxu1 %vm435_vm3, %v6054_v55 }
  0xd9   : > { %4705 = vmatmul.mubr.msk.bf16.gmra.mrb[32].mxu0 %vm435_vm3, %v2125_v11 }
  0xda   : > { %4710 = vmatprep.mubr.msk.bf16.mxu0 %vm435_vm3, %v5784_v26  ;;  %v6087_v26 = vsel %vm908_vm6, %v934_v61, %v936_v51 }
  0xdf   : > { %4541 = vmatmul.mubr.msk.bf16.gmra.mrb[20].mxu1 %vm435_vm3, %v6069_v33 }
  0xe0   : > { %4544 = vmatprep.mubr.msk.bf16.mxu1 %vm435_vm3, %v6072_v34 }
  0xe1   : > { %4711 = vmatmul.mubr.msk.bf16.vlgmr.msra.gmra.mrb[0].mxu0 %vm435_vm3, %v5791_v5  ;;  %v6098_v5 = vrot.slane %v5606_v13, 1 }
  0xe2   : > { %4747 = vmatpush3.bf16.msra.mxu0 %v2801_v16  ;;  %4714 = vmatprep.mubr.msk.bf16.mxu0 %vm435_vm3, %v5809_v24  ;;  %v6105_v24 = vsel %vm908_vm6, %v938_v62, %v940_v48  ;;  %v7979_v16 = vld [vmem:[#allocation17_spill] sm:$0xff]  ;;  %v7980_v62 = vld [vmem:[#allocation8_spill] sm:$0xff] }
  0xe3   : > { %v6109_v58 = vsel %vm908_vm6, %v940_v48, %v6098_v5 }
  0xe7   : > { %4545 = vmatmul.mubr.msk.bf16.gmra.mrb[24].mxu1 %vm435_vm3, %v6087_v26 }
  0xe8   : > { %4548 = vmatprep.mubr.msk.bf16.mxu1 %vm435_vm3, %v6090_v46 }
  0xe9   : > { %4715 = vmatmul.mubr.msk.bf16.gmra.mrb[4].mxu0 %vm435_vm3, %v5819_v54  ;;  %v2386_v54 = vrot.slane %v7972_v6, 2 }
  0xea   : > { %4718 = vmatprep.mubr.msk.bf16.mxu0 %vm435_vm3, %v5837_v3  ;;  %v945_v3 = vsel %vm908_vm6, %v6098_v5, %v944_v59  ;;  %v2403_v59 = vrot.slane %v7982_v20, 3 }
  0xeb   : > { %v2388_v29 = vor.u32 %v2387_v27, %v2386_v54  ;;  %v7984_v27 = vld [vmem:[#allocation22_spill] sm:$0xff] }
  0xed   : > { %v2389_v19 = vsel %vm2350_vm5, %v5872_v37, %v2388_v29  ;;  %v2393_v1 = vsel %vm2350_vm5, %v2388_v29, %v2392_v32  ;;  %v2399_v37 = vrot.slane %v7979_v16, 3 }
  0xef   : > { %4549 = vmatmul.mubr.msk.bf16.gmra.mrb[28].mxu1 %vm435_vm3, %v6105_v24 }
  0xf0   : > { %4552 = vmatprep.mubr.msk.bf16.mxu1 %vm435_vm3, %v6109_v58 }
  0xf1   : > { %4719 = vmatmul.mubr.msk.bf16.gmra.mrb[8].mxu0 %vm435_vm3, %v5852_v14  ;;  %v7976_v14 = vld [vmem:[#allocation18_spill] sm:$0xff] }
  0xf2   : > { %4722 = vmatprep.mubr.msk.bf16.mxu0 %vm435_vm3, %v5865_v60  ;;  %v2394_v35 = vrot.slane %v7976_v14, 2  ;;  %v2395_v60 = vrot.slane %v7977_v53, 3 }
  0xf4   : > { %v2396_v11 = vor.u32 %v2395_v60, %v2394_v35  ;;  %v7986_v35 = vld [vmem:[#allocation21_spill] sm:$0xff] }
  0xf5   : > { %v1519_v60 = vshrl.u32 %v7986_v35, 16 }
  0xf6   : > { %v2397_v51 = vsel %vm2350_vm5, %v2392_v32, %v2396_v11  ;;  %v1522_v32 = vshll.u32 %v7986_v35, 16 }
  0xf7   : > { %4553 = vmatmul.mubr.msk.bf16.gmra.mrb[32].mxu1 %vm435_vm3, %v945_v3  ;;  %v2407_v3 = vrot.slane %v7984_v27, 3 }
  0xf8   : > { %4558 = vmatprep.mubr.msk.bf16.mxu1 %vm435_vm3, %v5979_v7  ;;  %v7978_v7 = vld [vmem:[#allocation19_spill] sm:$0xff] }
  0xf9   : > { %4723 = vmatmul.mubr.msk.bf16.gmra.mrb[12].mxu0 %vm435_vm3, %v5881_v42  ;;  %v2398_v61 = vrot.slane %v7978_v7, 2  ;;  %v7981_v42 = vld [vmem:[#allocation23_spill] sm:$0xff] }
  0xfa   : > { %4726 = vmatprep.mubr.msk.bf16.mxu0 %vm435_vm3, %v2389_v19  ;;  %v2402_v48 = vrot.slane %v7981_v42, 2  ;;  %v2411_v19 = vrot.slane %v5626_v39, 3 }
  0xfc   : > { %v2404_v6 = vor.u32 %v2403_v59, %v2402_v48 }
  0xff   : > { %4559 = vmatmul.mubr.msk.bf16.vlgmr.msra.gmra.mrb[0].mxu1 %vm435_vm3, %v5982_v2  ;;  %v2400_v2 = vor.u32 %v2399_v37, %v2398_v61  ;;  %v2414_v37 = vrot.slane %v1519_v60, 2 }
 0x100   : > { %4562 = vmatprep.mubr.msk.bf16.mxu1 %vm435_vm3, %v5999_v49  ;;  %4785 = vmatpush3.bf16.msra.mxu1 %v7980_v62  ;;  %v7983_v49 = vld [vmem:[#allocation24_spill] sm:$0xff] }
 0x101   : > { %4727 = vmatmul.mubr.msk.bf16.gmra.mrb[16].mxu0 %vm435_vm3, %v2393_v1  ;;  %v2401_v54 = vsel %vm2350_vm5, %v2396_v11, %v2400_v2  ;;  %v2406_v30 = vrot.slane %v7983_v49, 2  ;;  %v2405_v29 = vsel %vm2350_vm5, %v2400_v2, %v2404_v6  ;;  %v2412_v11 = vor.u32 %v2411_v19, %v2410_v44 }
 0x102   : > { %4730 = vmatprep.mubr.msk.bf16.mxu0 %vm435_vm3, %v2397_v51  ;;  %v2419_v1 = vshrl.u32 %v5729_v12, 16  ;;  %v2415_v51 = vrot.slane %v1522_v32, 3  ;;  %v2428_v2 = vshrl.u32 %v6039_v52, 16  ;;  %v2709_v19 = vrot.slane %v5434_v9, 3 }
 0x103   : > { %v2714_v9 = vrot.slane %v5463_v31, 3 }
 0x104   : > { %v2421_v48 = vrot.slane %v2419_v1, 2  ;;  %v1494_v1 = vrot.slane %v7974_v0, 1  ;;  %v2726_v0 = vrot.slane %v5586_v56, 3 }
 0x107   : > { %4563 = vmatmul.mubr.msk.bf16.gmra.mrb[4].mxu1 %vm435_vm3, %v6002_v4  ;;  %v2408_v4 = vor.u32 %v2407_v3, %v2406_v30 }
 0x108   : > { %4566 = vmatprep.mubr.msk.bf16.mxu1 %vm435_vm3, %v6015_v36  ;;  %v2422_v36 = vshll.u32 %v5729_v12, 16 }
 0x109   : > { %4731 = vmatmul.mubr.msk.bf16.gmra.mrb[20].mxu0 %vm435_vm3, %v2401_v54  ;;  %v2409_v61 = vsel %vm2350_vm5, %v2404_v6, %v2408_v4  ;;  %v2413_v62 = vsel %vm2350_vm5, %v2408_v4, %v2412_v11  ;;  %v2431_v6 = vshll.u32 %v6039_v52, 16  ;;  %v2710_v4 = vrot.slane %v5448_v17, 3 }
 0x10a   : > { %4734 = vmatprep.mubr.msk.bf16.mxu0 %vm435_vm3, %v2405_v29  ;;  %v2424_v59 = vrot.slane %v2422_v36, 3  ;;  %v1495_v36 = vrot.slane %v7975_v40, 2  ;;  %v1499_v40 = vrot.slane %v7977_v53, 2 }
 0x10b   : > { %v2433_v3 = vrot.slane %v2431_v6, 3  ;;  %v1507_v6 = vrot.slane %v7982_v20, 2 }
 0x10c   : > { %v2425_v54 = vor.u32 %v2424_v59, %v2421_v48  ;;  %v1502_v48 = vrot.slane %v7978_v7, 1  ;;  %v1503_v59 = vrot.slane %v7979_v16, 2  ;;  %v2730_v7 = vrot.slane %v5623_v38, 3 }
 0x10d   : > { %v1506_v16 = vrot.slane %v7981_v42, 1  ;;  %v2732_v42 = vrot.slane %v5660_v21, 3 }
 0x10f   : > { %4567 = vmatmul.mubr.msk.bf16.gmra.mrb[8].mxu1 %vm435_vm3, %v6018_v22  ;;  %v2416_v22 = vor.u32 %v2415_v51, %v2414_v37  ;;  %v1496_v37 = vor.u32 %v1495_v36, %v1494_v1  ;;  %v7987_v51 = vld [vmem:[#allocation13_spill] sm:$0xff]  ;;  %v2733_v21 = vsel %vm2708_vm7, %v2730_v7, %v2732_v42 }
 0x110   : > { %4570 = vmatprep.mubr.msk.bf16.mxu1 %vm435_vm3, %v6031_v10  ;;  %v2430_v10 = vrot.slane %v2428_v2, 2  ;;  %v1504_v2 = vor.u32 %v1503_v59, %v1502_v48 }
 0x111   : > { %4735 = vmatmul.mubr.msk.bf16.gmra.mrb[24].mxu0 %vm435_vm3, %v2409_v61  ;;  %v2417_v30 = vsel %vm2350_vm5, %v2412_v11, %v2416_v22  ;;  %v2426_v29 = vsel %vm2350_vm5, %v2416_v22, %v2425_v54  ;;  %v2712_v11 = vrot.slane %v5451_v18, 3  ;;  %v2718_v18 = vrot.slane %v5497_v50, 3 }
 0x112   : > { %4738 = vmatprep.mubr.msk.bf16.mxu0 %vm435_vm3, %v2413_v62  ;;  %v2434_v44 = vor.u32 %v2433_v3, %v2430_v10  ;;  %v2722_v50 = vrot.slane %v5552_v23, 3  ;;  %v2724_v23 = vrot.slane %v5559_v28, 3  ;;  %v1497_v62 = vsel %vm1450_vm2, %v7987_v51, %v1496_v37 }
 0x113   : > { %v2713_v17 = vsel %vm2708_vm7, %v2710_v4, %v2712_v11  ;;  %v1511_v10 = vrot.slane %v7984_v27, 2  ;;  %v1514_v27 = vrot.slane %v7985_v15, 1  ;;  %v1528_v15 = vshrl.u32 %v5911_v57, 16 }
 0x114   : > { %v2725_v22 = vsel %vm2708_vm7, %v2722_v50, %v2724_v23  ;;  %v2727_v28 = vsel %vm2708_vm7, %v2724_v23, %v2726_v0 }
 0x117   : > { %4571 = vmatmul.mubr.msk.bf16.gmra.mrb[12].mxu1 %vm435_vm3, %v6034_v45  ;;  %v2435_v45 = vsel %vm2350_vm5, %v2425_v54, %v2434_v44  ;;  %v1515_v44 = vrot.slane %v5626_v39, 2  ;;  %v1531_v39 = vshll.u32 %v5911_v57, 16 }
 0x118   : > { %4574 = vmatprep.mubr.msk.bf16.mxu1 %vm435_vm3, %v6051_v43  ;;  %v2711_v43 = vsel %vm2708_vm7, %v2709_v19, %v2710_v4  ;;  %v1521_v4 = vrot.slane %v1519_v60, 1  ;;  %v2736_v60 = vrot.slane %v5698_v47, 3  ;;  %v2740_v47 = vrot.slane %v7986_v35, 3 }
 0x119   : > { %4739 = vmatmul.mubr.msk.bf16.gmra.mrb[28].mxu0 %vm435_vm3, %v2417_v30  ;;  %v1510_v30 = vrot.slane %v7983_v49, 1  ;;  %v2734_v49 = vrot.slane %v5671_v8, 3 }
 0x11a   : > { %4742 = vmatprep.mubr.msk.bf16.mxu0 %vm435_vm3, %v2426_v29  ;;  %v1508_v29 = vor.u32 %v1507_v6, %v1506_v16 }
 0x11b   : > { %v1512_v38 = vor.u32 %v1511_v10, %v1510_v30  ;;  %v2735_v8 = vsel %vm2708_vm7, %v2732_v42, %v2734_v49 }
 0x11c   : > { %v1509_v20 = vsel %vm1450_vm2, %v1504_v2, %v1508_v29 }
 0x11d   : > { %v1513_v19 = vsel %vm1450_vm2, %v1508_v29, %v1512_v38 }
 0x11f   : > { %4575 = vmatmul.mubr.msk.bf16.gmra.mrb[16].mxu1 %vm435_vm3, %v6054_v55  ;;  %v2715_v55 = vsel %vm2708_vm7, %v2712_v11, %v2714_v9 }
 0x120   : > { %4578 = vmatprep.mubr.msk.bf16.mxu1 %vm435_vm3, %v6069_v33  ;;  %v2716_v33 = vrot.slane %v5480_v41, 3  ;;  %v2720_v41 = vrot.slane %v5525_v63, 3  ;;  %v1224_v63 = vrot.slane %v5911_v57, 1 }
 0x121   : > { %4743 = vmatmul.mubr.msk.bf16.gmra.mrb[32].mxu0 %vm435_vm3, %v2435_v45  ;;  %v1524_v45 = vrot.slane %v1522_v32, 2 }
 0x122   : > { %4748 = vmatprep.mubr.msk.bf16.mxu0 %vm435_vm3, %v2711_v43  ;;  %v2717_v31 = vsel %vm2708_vm7, %v2714_v9, %v2716_v33  ;;  %v2723_v61 = vsel %vm2708_vm7, %v2720_v41, %v2722_v50  ;;  %v1516_v43 = vor.u32 %v1515_v44, %v1514_v27  ;;  %v2738_v9 = vrot.slane %v5606_v13, 3 }
 0x123   : > { %v1525_v11 = vor.u32 %v1524_v45, %v1521_v4  ;;  %v2744_v50 = vrot.slane %v6039_v52, 3 }
 0x124   : > { %v1517_v32 = vsel %vm1450_vm2, %v1512_v38, %v1516_v43  ;;  %v2739_v57 = vsel %vm2708_vm7, %v2736_v60, %v2738_v9 }
 0x127   : > { %4579 = vmatmul.mubr.msk.bf16.gmra.mrb[20].mxu1 %vm435_vm3, %v6072_v34  ;;  %v2719_v34 = vsel %vm2708_vm7, %v2716_v33, %v2718_v18  ;;  %v1526_v33 = vsel %vm1450_vm2, %v1516_v43, %v1525_v11 }
 0x128   : > { %4582 = vmatprep.mubr.msk.bf16.mxu1 %vm435_vm3, %v6087_v26  ;;  %v1222_v26 = vrot.slane %v7986_v35, 1  ;;  %v3016_v35 = vlaneseq }
 0x129   : > { %4749 = vmatmul.mubr.msk.bf16.vlgmr.msra.gmra.mrb[0].mxu0 %vm435_vm3, %v2713_v17  ;;  %v1530_v17 = vrot.slane %v1528_v15, 1 }
 0x12a   : > { %4752 = vmatprep.mubr.msk.bf16.mxu0 %vm435_vm3, %v2715_v55  ;;  %v1533_v55 = vrot.slane %v1531_v39, 2  ;;  %v6300_v1 = vshrl.u32 %v3016_v35, 7 }
 0x12c   : > { %v3020_v36 = vadd.s32 24, %v6300_v1  ;;  %v3018_v52 = vadd.s32 8, %v6300_v1  ;;  %v6334_v6 = vadd.s32 40, %v6300_v1  ;;  %v6410_v35 = vadd.s32 96, %v6300_v1 }
 0x12f   : > { %4583 = vmatmul.mubr.msk.bf16.gmra.mrb[24].mxu1 %vm435_vm3, %v6090_v46  ;;  %v1223_v46 = vsel %vm908_vm6, %v6098_v5, %v1222_v26  ;;  %v1225_v5 = vsel %vm908_vm6, %v1222_v26, %v1224_v63  ;;  %v2741_v26 = vsel %vm2708_vm7, %v2738_v9, %v2740_v47 }
 0x130   : > { %4586 = vmatprep.mubr.msk.bf16.mxu1 %vm435_vm3, %v6105_v24  ;;  %v2721_v24 = vsel %vm2708_vm7, %v2718_v18, %v2720_v41  ;;  %v2737_v18 = vsel %vm2708_vm7, %v2734_v49, %v2736_v60 }
 0x131   : > { %4753 = vmatmul.mubr.msk.bf16.gmra.mrb[4].mxu0 %vm435_vm3, %v2717_v31  ;;  %v1534_v31 = vor.u32 %v1533_v55, %v1530_v17 }
 0x132   : > { %4756 = vmatprep.mubr.msk.bf16.mxu0 %vm435_vm3, %v2719_v34  ;;  %v2742_v34 = vrot.slane %v5729_v12, 3  ;;  %v3019_v12 = vadd.s32 16, %v6300_v1 }
 0x133   : > { %v1535_v13 = vsel %vm1450_vm2, %v1525_v11, %v1534_v31  ;;  %v6370_v11 = vadd.s32 72, %v6300_v1 }
 0x134   : > { %v2743_v41 = vsel %vm2708_vm7, %v2740_v47, %v2742_v34 }
 0x137   : > { %4587 = vmatmul.mubr.msk.bf16.gmra.mrb[28].mxu1 %vm435_vm3, %v6109_v58  ;;  %v1498_v58 = vrot.slane %v7976_v14, 1  ;;  %v2728_v14 = vrot.slane %v5614_v25, 3 }
 0x138   : > { %4590 = vmatprep.mubr.msk.bf16.mxu1 %vm435_vm3, %v1223_v46  ;;  %v2745_v46 = vsel %vm2708_vm7, %v2742_v34, %v2744_v50 }
 0x139   : > { %4757 = vmatmul.mubr.msk.bf16.gmra.mrb[8].mxu0 %vm435_vm3, %v2721_v24  ;;  %v1500_v56 = vor.u32 %v1499_v40, %v1498_v58  ;;  %v2729_v3 = vsel %vm2708_vm7, %v2726_v0, %v2728_v14  ;;  %v2731_v25 = vsel %vm2708_vm7, %v2728_v14, %v2730_v7  ;;  %v3023_v0 = vadd.s32 48, %v6300_v1 }
 0x13a   : > { %4760 = vmatprep.mubr.msk.bf16.mxu0 %vm435_vm3, %v2723_v61  ;;  %v6304_v24 = vmul.u32.u64.low 3817748708, %v3019_v12  ;;  %v6305_v61 = vmul.u32.u64.high 3817748708, %v3019_v12, %v6304_v24  ;;  %v3021_v58 = vadd.s32 32, %v6300_v1 }
 0x13b   : > { %v1501_v53 = vsel %vm1450_vm2, %v1496_v37, %v1500_v56  ;;  %v1505_v54 = vsel %vm1450_vm2, %v1500_v56, %v1504_v2  ;;  %v6308_v63 = vmul.u32.u64.low 3817748708, %v6300_v1  ;;  %v6309_v37 = vmul.u32.u64.high 3817748708, %v6300_v1, %v6308_v63 }
 0x13c   : > { %v6317_v40 = vmul.u32.u64.low 3817748708, %v3018_v52  ;;  %v6318_v51 = vmul.u32.u64.high 3817748708, %v3018_v52, %v6317_v40  ;;  %v3081_v48 = vshrl.u32 %v6305_v61, 4  ;;  %v6426_v63 = vadd.s32 120, %v6300_v1 }
 0x13d   : > { %v3059_v2 = vshrl.u32 %v6309_v37, 4 }
 0x13e   : > { %v3082_v16 = vmul.u32 18, %v3081_v48  ;;  %v3070_v10 = vshrl.u32 %v6318_v51, 4  ;;  %v8096_v48 = vmov 0 }
 0x13f   : > { %4591 = vmatmul.mubr.msk.bf16.gmra.mrb[32].mxu1 %vm435_vm3, %v1225_v5  ;;  %v6312_v23 = vmul.u32.u64.low 3817748708, %v3020_v36  ;;  %v6313_v5 = vmul.u32.u64.high 3817748708, %v3020_v36, %v6312_v23  ;;  %v3060_v30 = vmul.u32 18, %v3059_v2 }
 0x140   : > { %4616 = vmatprep.mubr.msk.bf16.mxu1 %vm435_vm3, %v1497_v62  ;;  %v3024_v62 = vadd.s32 56, %v6300_v1  ;;  %v6343_v29 = vsub.s32 %v3019_v12, %v3082_v16  ;;  %v3071_v45 = vmul.u32 18, %v3070_v10 }
 0x141   : > { %4761 = vmatmul.mubr.msk.bf16.gmra.mrb[12].mxu0 %vm435_vm3, %v2725_v22  ;;  %v6322_v59 = vmul.u32.u64.low 3817748708, %v3023_v0  ;;  %v6323_v22 = vmul.u32.u64.high 3817748708, %v3023_v0, %v6322_v59  ;;  %v3092_v7 = vshrl.u32 %v6313_v5, 4  ;;  %v6359_v4 = vsub.s32 %v6300_v1, %v3060_v30 }
 0x142   : > { %4764 = vmatprep.mubr.msk.bf16.mxu0 %vm435_vm3, %v2727_v28  ;;  %v6325_v28 = vmul.u32.u64.low 3817748708, %v3021_v58  ;;  %v6326_v56 = vmul.u32.u64.high 3817748708, %v3021_v58, %v6325_v28  ;;  %vm3451_vm8 = vcmp.ne.s32.totalorder %v6343_v29, 0  ;;  %vm3487_vm9 = vcmp.lt.s32.totalorder %v6343_v29, 0 }
 0x143   : > { %v3125_v38 = vshrl.u32 %v6323_v22, 4  ;;  %v6378_v17 = vadd.s32 18, %v6343_v29  ;;  %vm3449_vm10 = vcmp.ne.s32.totalorder %v6359_v4, 0  ;;  %v6381_v55 = vsub.s32 %v3018_v52, %v3071_v45  ;;  %vm6416_vm0 = vmand %vm3487_vm9, %vm3451_vm8 }
 0x144   : > { %v3103_v49 = vshrl.u32 %v6326_v56, 4  ;;  %vm3485_vm11 = vcmp.lt.s32.totalorder %v6359_v4, 0  ;;  %v6469_v59 = vmul.u32.u64.low 3817748708, %v6410_v35  ;;  %v6470_v22 = vmul.u32.u64.high 3817748708, %v6410_v35, %v6469_v59 }
 0x145   : > { %v3126_v39 = vmul.u32 18, %v3125_v38  ;;  %vm3450_vm14 = vcmp.ne.s32.totalorder %v6381_v55, 0  ;;  %vm3486_vm15 = vcmp.lt.s32.totalorder %v6381_v55, 0  ;;  %vm6434_vm1 = vmand %vm3485_vm11, %vm3449_vm10  ;;  %v6439_v23 = vadd.s32 18, %v6381_v55 }
 0x146   : > { %v3104_v60 = vmul.u32 18, %v3103_v49  ;;  %vm6462_vm7 = vmand %vm3486_vm15, %vm3450_vm14  ;;  %v8000_v56 = vmov 0 }
 0x147   : > { %4617 = vmatmul.mubr.msk.bf16.vlgmr.msra.gmra.mrb[20].mxu1 %vm435_vm3, %v1501_v53  ;;  %v6329_v14 = vmul.u32.u64.low 3817748708, %v3024_v62  ;;  %v6330_v53 = vmul.u32.u64.high 3817748708, %v3024_v62, %v6329_v14  ;;  %v6391_v31 = vsub.s32 %v3023_v0, %v3126_v39 }
 0x148   : > { %4620 = vmatprep.mubr.msk.bf16.mxu1 %vm435_vm3, %v1505_v54  ;;  %v6337_v54 = vadd.s32 80, %v6300_v1 }
 0x149   : > { %4765 = vmatmul.mubr.msk.bf16.gmra.mrb[16].mxu0 %vm435_vm3, %v2729_v3  ;;  %v3093_v3 = vmul.u32 18, %v3092_v7  ;;  %7988 = vst [vmem:[#allocation11_spill] sm:$0xff] %v6391_v31  ;;  %vm3455_vm2 = vcmp.ne.s32.totalorder %v6391_v31, 0  ;;  %v6483_v2 = vadd.s32 18, %v6391_v31 }
 0x14a   : > { %4768 = vmatprep.mubr.msk.bf16.mxu0 %vm435_vm3, %v2731_v25  ;;  %v6341_v25 = vadd.s32 64, %v6300_v1  ;;  %v6352_v27 = vmul.u32.u64.low 3817748708, %v6337_v54  ;;  %v6353_v44 = vmul.u32.u64.high 3817748708, %v6337_v54, %v6352_v27 }
 0x14b   : > { %8003 = vst [vmem:[#allocation18_spill] sm:$0xff] %v6483_v2  ;;  %v6516_v27 = vadd.s32 104, %v6300_v1 }
 0x14c   : > { %v6365_v43 = vmul.u32.u64.low 3817748708, %v6341_v25  ;;  %v6366_v15 = vmul.u32.u64.high 3817748708, %v6341_v25, %v6365_v43  ;;  %v3169_v50 = vshrl.u32 %v6353_v44, 4 }
 0x14e   : > { %v3170_v40 = vmul.u32 18, %v3169_v50 }
 0x14f   : > { %4621 = vmatmul.mubr.msk.bf16.gmra.mrb[24].mxu1 %vm435_vm3, %v1509_v20  ;;  %v6347_v42 = vmul.u32.u64.low 3817748708, %v6334_v6  ;;  %v6348_v20 = vmul.u32.u64.high 3817748708, %v6334_v6, %v6347_v42 }
 0x150   : > { %4624 = vmatprep.mubr.msk.bf16.mxu1 %vm435_vm3, %v1513_v19  ;;  %v6356_v19 = vadd.s32 88, %v6300_v1 }
 0x151   : > { %4769 = vmatmul.mubr.msk.bf16.gmra.mrb[20].mxu0 %vm435_vm3, %v2733_v21  ;;  %v3136_v21 = vshrl.u32 %v6330_v53, 4  ;;  %v3114_v47 = vshrl.u32 %v6348_v20, 4  ;;  %v6486_v53 = vmul.u32.u64.low 3817748708, %v6426_v63  ;;  %v6487_v7 = vmul.u32.u64.high 3817748708, %v6426_v63, %v6486_v53 }
 0x152   : > { %4772 = vmatprep.mubr.msk.bf16.mxu0 %vm435_vm3, %v2735_v8  ;;  %v6362_v8 = vsub.s32 %v3020_v36, %v3093_v3  ;;  %v3147_v36 = vshrl.u32 %v6366_v15, 4  ;;  %v8008_v20 = vmov 0 }
 0x153   : > { %v3115_v5 = vmul.u32 18, %v3114_v47 }
 0x154   : > { %vm3452_vm12 = vcmp.ne.s32.totalorder %v6362_v8, 0  ;;  %vm3488_vm13 = vcmp.lt.s32.totalorder %v6362_v8, 0  ;;  %v3148_v14 = vmul.u32 18, %v3147_v36  ;;  %v6569_v36 = vadd.s32 128, %v6300_v1 }
 0x155   : > { %vm6449_vm4 = vmand %vm3488_vm13, %vm3452_vm12  ;;  %v6502_v3 = vsub.s32 %v6334_v6, %v3115_v5  ;;  %v3191_v5 = vshrl.u32 %v6470_v22, 4 }
 0x156   : > { %v6538_v15 = vsub.s32 %v6341_v25, %v3148_v14  ;;  %v3224_v14 = vshrl.u32 %v6487_v7, 4 }
 0x157   : > { %4625 = vmatmul.mubr.msk.bf16.gmra.mrb[28].mxu1 %vm435_vm3, %v1517_v32  ;;  %v6374_v32 = vmul.u32.u64.low 3817748708, %v6356_v19  ;;  %v6375_v9 = vmul.u32.u64.high 3817748708, %v6356_v19, %v6374_v32  ;;  %8007 = vst [vmem:[#allocation19_spill] sm:$0xff] %v6502_v3  ;;  %v6555_v25 = vadd.s32 18, %v6502_v3  ;;  %vm3454_vm13 = vcmp.ne.s32.totalorder %v6502_v3, 0 }
 0x158   : > { %4628 = vmatprep.mubr.msk.bf16.mxu1 %vm435_vm3, %v1526_v33  ;;  %v3137_v33 = vmul.u32 18, %v3136_v21  ;;  %v6531_v21 = vsub.s32 %v6337_v54, %v3170_v40  ;;  %8012 = vst [vmem:[#allocation23_spill] sm:$0xff] %v6538_v15  ;;  %vm3490_vm14 = vcmp.lt.s32.totalorder %v6502_v3, 0  ;;  %v6583_v40 = vadd.s32 136, %v6300_v1 }
 0x159   : > { %4773 = vmatmul.mubr.msk.bf16.gmra.mrb[24].mxu0 %vm435_vm3, %v2737_v18  ;;  %v6385_v18 = vadd.s32 18, %v6359_v4  ;;  %v3180_v51 = vshrl.u32 %v6375_v9, 4  ;;  %8014 = vst [vmem:[#allocation24_spill] sm:$0xff] %v6555_v25  ;;  %v6595_v22 = vadd.s32 18, %v6538_v15  ;;  %v6609_v9 = vadd.s32 160, %v6300_v1 }
 0x15a   : > { %4776 = vmatprep.mubr.msk.bf16.mxu0 %vm435_vm3, %v2739_v57  ;;  %v6389_v57 = vadd.s32 112, %v6300_v1  ;;  %8011 = vst [vmem:[#allocation8_spill] sm:$0xff] %v6531_v21  ;;  %vm3459_vm15 = vcmp.ne.s32.totalorder %v6531_v21, 0  ;;  %v6620_v44 = vmul.u32.u64.low 3817748708, %v6583_v40  ;;  %v6621_v45 = vmul.u32.u64.high 3817748708, %v6583_v40, %v6620_v44 }
 0x15b   : > { %v3181_v49 = vmul.u32 18, %v3180_v51  ;;  %8019 = vst [vmem:[#allocation25_spill] sm:$0xff] %v6595_v22  ;;  %v6643_v44 = vadd.s32 168, %v6300_v1  ;;  %v8047_v3 = vmov 0 }
 0x15c   : > { %v6422_v24 = vmul.u32.u64.low 3817748708, %v6389_v57  ;;  %v6423_v61 = vmul.u32.u64.high 3817748708, %v6389_v57, %v6422_v24 }
 0x15e   : > { %v3213_v39 = vshrl.u32 %v6423_v61, 4  ;;  %v6576_v61 = vadd.s32 18, %v6531_v21 }
 0x15f   : > { %4629 = vmatmul.mubr.msk.bf16.gmra.mrb[32].mxu1 %vm435_vm3, %v1535_v13  ;;  %v6395_v13 = vmul.u32.u64.low 3817748708, %v6370_v11  ;;  %v6396_v34 = vmul.u32.u64.high 3817748708, %v6370_v11, %v6395_v13 }
 0x160   : > { %v6562_v13 = vsub.s32 %v6356_v19, %v3181_v49  ;;  %8017 = vst [vmem:[#allocation21_spill] sm:$0xff] %v6576_v61  ;;  %v6580_v19 = vadd.s32 152, %v6300_v1  ;;  %v3214_v59 = vmul.u32 18, %v3213_v39 }
 0x161   : > { %4777 = vmatmul.mubr.msk.bf16.gmra.mrb[28].mxu0 %vm435_vm3, %v2741_v26  ;;  %v6400_v26 = vadd.s32 18, %v6362_v8  ;;  %v3158_v38 = vshrl.u32 %v6396_v34, 4  ;;  %v6565_v34 = vmul.u32.u64.low 3817748708, %v6516_v27  ;;  %v6566_v50 = vmul.u32.u64.high 3817748708, %v6516_v27, %v6565_v34 }
 0x162   : > { %4780 = vmatprep.mubr.msk.bf16.mxu0 %vm435_vm3, %v2743_v41  ;;  %v6402_v41 = vsub.s32 %v3021_v58, %v3104_v60  ;;  %v6542_v60 = vadd.s32 144, %v6300_v1  ;;  %v6601_v34 = vadd.s32 176, %v6300_v1  ;;  %v7005_v58 = vadd.s32 200, %v6300_v1 }
 0x163   : > { %v6605_v39 = vmul.u32.u64.low 3817748708, %v6569_v36  ;;  %v6606_v7 = vmul.u32.u64.high 3817748708, %v6569_v36, %v6605_v39  ;;  %v6613_v43 = vmul.u32.u64.low 3817748708, %v6580_v19  ;;  %v6614_v54 = vmul.u32.u64.high 3817748708, %v6580_v19, %v6613_v43 }
 0x164   : > { %vm3453_vm5 = vcmp.ne.s32.totalorder %v6402_v41, 0  ;;  %vm3489_vm6 = vcmp.lt.s32.totalorder %v6402_v41, 0  ;;  %v6496_v30 = vadd.s32 18, %v6402_v41  ;;  %v6626_v39 = vadd.s32 18, %v6562_v13 }
 0x165   : > { %vm6491_vm11 = vmand %vm3489_vm6, %vm3453_vm5  ;;  %vm3493_vm5 = vcmp.lt.s32.totalorder %v6538_v15, 0 }
 0x169   : > { %4781 = vmatmul.mubr.msk.bf16.gmra.mrb[32].mxu0 %vm435_vm3, %v2745_v46  ;;  %v6407_v46 = vsub.s32 %v3024_v62, %v3137_v33  ;;  %vm3491_vm3 = vcmp.lt.s32.totalorder %v6391_v31, 0  ;;  %v3159_v33 = vmul.u32 18, %v3158_v38 }
 0x16a   : > { %vm6478_vm10 = vmand %vm3491_vm3, %vm3455_vm2  ;;  %vm3495_vm2 = vcmp.lt.s32.totalorder %v6531_v21, 0  ;;  %vm3457_vm3 = vcmp.ne.s32.totalorder %v6538_v15, 0  ;;  %v6590_v53 = vmul.u32.u64.low 3817748708, %v6542_v60  ;;  %v6591_v38 = vmul.u32.u64.high 3817748708, %v6542_v60, %v6590_v53 }
 0x16b   : > { %7989 = vst [vmem:[#allocation10_spill] sm:$0xff] %v6407_v46  ;;  %vm3456_vm8 = vcmp.ne.s32.totalorder %v6407_v46, 0  ;;  %vm3492_vm9 = vcmp.lt.s32.totalorder %v6407_v46, 0  ;;  %v8001_v56 = vsel %vm6478_vm10, 4294967295, %v8000_v56  ;;  %v6499_v10 = vadd.s32 18, %v6407_v46  ;;  %vm6685_vm6 = vmand %vm3495_vm2, %vm3459_vm15 }
 0x16c   : > { %8002 = vst [vmem:[#allocation14_spill] sm:$0xff] %v8001_v56  ;;  %vm6511_vm12 = vmand %vm3492_vm9, %vm3456_vm8  ;;  %v6598_v49 = vsub.s32 %v6370_v11, %v3159_v33  ;;  %v3192_v53 = vmul.u32 18, %v3191_v5  ;;  %v6617_v11 = vsub.s32 %v6389_v57, %v3214_v59  ;;  %v3225_v33 = vmul.u32 18, %v3224_v14 }
 0x16d   : > { %8006 = vst [vmem:[#allocation16_spill] sm:$0xff] %v6499_v10  ;;  %v8009_v20 = vsel %vm6511_vm12, 4294967295, %v8008_v20  ;;  %v6629_v6 = vmul.u32.u64.low 3817748708, %v6601_v34  ;;  %v6630_v5 = vmul.u32.u64.high 3817748708, %v6601_v34, %v6629_v6  ;;  %v3202_v57 = vshrl.u32 %v6566_v50, 4  ;;  %vm6669_vm8 = vmand %vm3490_vm14, %vm3454_vm13 }
 0x16e   : > { %8010 = vst [vmem:[#allocation17_spill] sm:$0xff] %v8009_v20  ;;  %v6639_v59 = vmul.u32.u64.low 3817748708, %v6609_v9  ;;  %v6640_v14 = vmul.u32.u64.high 3817748708, %v6609_v9, %v6639_v59  ;;  %v6650_v6 = vsub.s32 %v6410_v35, %v3192_v53  ;;  %vm6698_vm13 = vmand %vm3493_vm5, %vm3457_vm3  ;;  %v3268_v10 = vshrl.u32 %v6614_v54, 4 }
 0x16f   : > { %v6662_v59 = vsub.s32 %v6426_v63, %v3225_v33  ;;  %v8026_v63 = vmov 0  ;;  %v3235_v33 = vshrl.u32 %v6606_v7, 4  ;;  %vm8031_vm15 = vcmp.ne.s32.totalorder %v6562_v13, 0 }
 0x170   : > { %v8027_v63 = vsel %vm6685_vm6, 4294967295, %v8026_v63  ;;  %vm8032_vm2 = vcmp.lt.s32.totalorder %v6562_v13, 0  ;;  %vm3497_vm3 = vcmp.lt.s32.totalorder %v6650_v6, 0  ;;  %vm8036_vm14 = vcmp.ne.s32.totalorder %v6598_v49, 0 }
 0x171   : > { %8028 = vst [vmem:[#allocation30_spill] sm:$0xff] %v8027_v63  ;;  %vm6712_vm9 = vmand %vm8032_vm2, %vm8031_vm15  ;;  %vm3464_vm5 = vcmp.ne.s32.totalorder %v6662_v59, 0  ;;  %vm8037_vm12 = vcmp.lt.s32.totalorder %v6598_v49, 0  ;;  %v3301_v31 = vshrl.u32 %v6630_v5, 4  ;;  %v6750_v5 = vadd.s32 18, %v6617_v11 }
 0x172   : > { %vm6725_vm10 = vmand %vm8037_vm12, %vm8036_vm14  ;;  %vm8041_vm12 = vcmp.ne.s32.totalorder %v6617_v11, 0  ;;  %vm8042_vm14 = vcmp.lt.s32.totalorder %v6617_v11, 0  ;;  %vm8046_vm15 = vcmp.ne.s32.totalorder %v6650_v6, 0  ;;  %v6768_v25 = vadd.s32 18, %v6650_v6 }
 0x173   : > { %vm6745_vm2 = vmand %vm8042_vm14, %vm8041_vm12  ;;  %v8051_v21 = vmov 0  ;;  %v3302_v15 = vmul.u32 18, %v3301_v31 }
 0x174   : > { %vm6763_vm12 = vmand %vm3497_vm3, %vm8046_vm15  ;;  %vm8050_vm3 = vcmp.lt.s32.totalorder %v6662_v59, 0  ;;  %v8146_v31 = vld [vmem:[#allocation16_spill] sm:$0xff] }
 0x175   : > { %v8048_v3 = vsel %vm6763_vm12, 4294967295, %v8047_v3  ;;  %vm6783_vm15 = vmand %vm8050_vm3, %vm3464_vm5 }
 0x176   : > { %v8052_v21 = vsel %vm6783_vm15, 4294967295, %v8051_v21 }
 0x1d2   : > { %v6428_v37 = vpop.f32.mrb[0].mxu1 }
 0x1d3   : > { %v6443_v0 = vpop.f32.mrb[1].mxu1 }
 0x1d4   : > { %v6456_v62 = vpop.f32.mrb[2].mxu1 }
 0x1d5   : > { %7996 = vst [vmem:[#allocation9_spill] sm:$0xff] %v6456_v62  ;;  %v6472_v28 = vpop.f32.mrb[3].mxu1  ;;  %v3236_v62 = vmul.u32 18, %v3235_v33  ;;  %v3269_v33 = vmul.u32 18, %v3268_v10 }
 0x1d6   : > { %7999 = vst [vmem:[#allocation15_spill] sm:$0xff] %v6472_v28  ;;  %v3246_v28 = vshrl.u32 %v6621_v45, 4  ;;  %v8085_v45 = vsel %vm6462_vm7, %v6439_v23, %v6381_v55 }
 0x1da   : > { %v6544_v32 = vpop.f32.mrb[4].mxu1 }
 0x1db   : > { %8013 = vst [vmem:[#allocation20_spill] sm:$0xff] %v6544_v32  ;;  %v6557_v47 = vpop.f32.mrb[5].mxu1  ;;  %v6691_v32 = vmul.u32.u64.low 3817748708, %v6643_v44  ;;  %v6692_v46 = vmul.u32.u64.high 3817748708, %v6643_v44, %v6691_v32 }
 0x1dc   : > { %8015 = vst [vmem:[#allocation22_spill] sm:$0xff] %v6557_v47  ;;  %v6571_v24 = vpop.f32.mrb[6].mxu1  ;;  %v6679_v47 = vadd.s32 192, %v6300_v1  ;;  %v8033_v32 = vmov 0 }
 0x1dd   : > { %8016 = vst [vmem:[#allocation12_spill] sm:$0xff] %v6571_v24  ;;  %v6585_v51 = vpop.f32.mrb[7].mxu1  ;;  %v6658_v24 = vadd.s32 18, %v6598_v49  ;;  %v8034_v32 = vsel %vm6712_vm9, 4294967295, %v8033_v32 }
 0x1de   : > { %8018 = vst [vmem:[#allocation13_spill] sm:$0xff] %v6585_v51  ;;  %v6633_v51 = vadd.s32 184, %v6300_v1  ;;  %v6732_v2 = vmul.u32.u64.low 3817748708, %v6679_v47  ;;  %v6733_v56 = vmul.u32.u64.high 3817748708, %v6679_v47, %v6732_v2 }
 0x1df   : > { %v3279_v2 = vshrl.u32 %v6640_v14, 4  ;;  %v6771_v14 = vadd.s32 18, %v6662_v59 }
 0x1e2   : > { %v6623_v42 = vpop.f32.mrb[8].mxu1 }
 0x1e3   : > { %8020 = vst [vmem:[#allocation26_spill] sm:$0xff] %v6623_v42  ;;  %v6635_v43 = vpop.f32.mrb[9].mxu1 }
 0x1e4   : > { %8021 = vst [vmem:[#allocation27_spill] sm:$0xff] %v6635_v43  ;;  %v6645_v42 = vpop.f32.mrb[10].mxu1  ;;  %v6653_v43 = vadd.s32 208, %v6300_v1 }
 0x1e5   : > { %8022 = vst [vmem:[#allocation28_spill] sm:$0xff] %v6645_v42  ;;  %v6655_v50 = vpop.f32.mrb[11].mxu1  ;;  %v3257_v42 = vshrl.u32 %v6591_v38, 4  ;;  %v3203_v38 = vmul.u32 18, %v3202_v57 }
 0x1e6   : > { %8023 = vst [vmem:[#allocation29_spill] sm:$0xff] %v6655_v50  ;;  %v6675_v53 = vmul.u32.u64.low 3817748708, %v6633_v51  ;;  %v6676_v50 = vmul.u32.u64.high 3817748708, %v6633_v51, %v6675_v53  ;;  %v6705_v57 = vmul.u32.u64.low 3817748708, %v6653_v43  ;;  %v6706_v20 = vmul.u32.u64.high 3817748708, %v6653_v43, %v6705_v57 }
 0x1e7   : > { %v8029_v53 = vmov 0  ;;  %v3258_v7 = vmul.u32 18, %v3257_v42  ;;  %v8038_v57 = vmov 0  ;;  %v6788_v61 = vsub.s32 %v6516_v27, %v3203_v38 }
 0x1e8   : > { %v8030_v53 = vsel %vm6698_vm13, 4294967295, %v8029_v53  ;;  %v8039_v57 = vsel %vm6725_vm10, 4294967295, %v8038_v57  ;;  %v3312_v22 = vshrl.u32 %v6676_v50, 4  ;;  %v3290_v38 = vshrl.u32 %v6692_v46, 4 }
 0x1e9   : > { %v6791_v10 = vsub.s32 %v6542_v60, %v3258_v7  ;;  %v3280_v60 = vmul.u32 18, %v3279_v2  ;;  %v6819_v50 = vsub.s32 %v6580_v19, %v3269_v33  ;;  %v3345_v27 = vshrl.u32 %v6706_v20, 4 }
 0x1ea   : > { %v6719_v54 = vpop.f32.mrb[12].mxu1  ;;  %vm3498_vm14 = vcmp.lt.s32.totalorder %v6788_v61, 0  ;;  %v3313_v19 = vmul.u32 18, %v3312_v22  ;;  %v3323_v2 = vshrl.u32 %v6733_v56, 4  ;;  %v6851_v56 = vadd.s32 18, %v6788_v61 }
 0x1eb   : > { %8035 = vst [vmem:[#allocation31_spill] sm:$0xff] %v6719_v54  ;;  %v6735_v42 = vpop.f32.mrb[13].mxu1  ;;  %v8043_v54 = vmov 0  ;;  %8053 = vst [vmem:[#allocation35_spill] sm:$0xff] %v6819_v50  ;;  %v6840_v33 = vsub.s32 %v6609_v9, %v3280_v60  ;;  %v3346_v22 = vmul.u32 18, %v3345_v27  ;;  %vm8064_vm12 = vcmp.ne.s32.totalorder %v6791_v10, 0 }
 0x1ec   : > { %8040 = vst [vmem:[#allocation32_spill] sm:$0xff] %v6735_v42  ;;  %v8044_v54 = vsel %vm6745_vm2, 4294967295, %v8043_v54  ;;  %v6753_v42 = vpop.f32.mrb[14].mxu1  ;;  %vm8060_vm2 = vcmp.ne.s32.totalorder %v6788_v61, 0  ;;  %vm8065_vm9 = vcmp.lt.s32.totalorder %v6791_v10, 0  ;;  %v6866_v60 = vadd.s32 18, %v6791_v10 }
 0x1ed   : > { %8045 = vst [vmem:[#allocation33_spill] sm:$0xff] %v6753_v42  ;;  %v6773_v42 = vpop.f32.mrb[15].mxu1  ;;  %8058 = vst [vmem:[#allocation40_spill] sm:$0xff] %v6840_v33  ;;  %v8068_v27 = vsel %vm6434_vm1, %v6385_v18, %v6359_v4  ;;  %v6893_v52 = vsub.s32 %v6633_v51, %v3313_v19  ;;  %v3324_v4 = vmul.u32 18, %v3323_v2  ;;  %vm8076_vm1 = vcmp.ne.s32.totalorder %v6819_v50, 0 }
 0x1ee   : > { %8049 = vst [vmem:[#allocation34_spill] sm:$0xff] %v6773_v42  ;;  %v3247_v42 = vmul.u32 18, %v3246_v28  ;;  %v6807_v28 = vsub.s32 %v6569_v36, %v3236_v62  ;;  %v6832_v36 = vsub.s32 %v6601_v34, %v3302_v15  ;;  %vm6846_vm3 = vmand %vm3498_vm14, %vm8060_vm2  ;;  %v8061_v15 = vmov 0 }
 0x1ef   : > { %v8062_v15 = vsel %vm6846_vm3, 4294967295, %v8061_v15  ;;  %vm6861_vm10 = vmand %vm8065_vm9, %vm8064_vm12  ;;  %v8066_v34 = vmov 0  ;;  %vm6878_vm15 = vcmp.lt.s32.totalorder %v8068_v27, 16  ;;  %8075 = vst [vmem:[#allocation43_spill] sm:$0xff] %v6893_v52  ;;  %v8078_v27 = vmov 0 }
 0x1f0   : > { %v6826_v46 = vsub.s32 %v6583_v40, %v3247_v42  ;;  %8056 = vst [vmem:[#allocation38_spill] sm:$0xff] %v6832_v36  ;;  %v3291_v40 = vmul.u32 18, %v3290_v38  ;;  %v8067_v34 = vsel %vm6861_vm10, 4294967295, %v8066_v34  ;;  %v6871_v38 = vadd.s32 216, %v6300_v1 }
 0x1f1   : > { %vm8071_vm9 = vcmp.ne.s32.totalorder %v6807_v28, 0  ;;  %vm8072_vm12 = vcmp.lt.s32.totalorder %v6807_v28, 0  ;;  %v6899_v18 = vadd.s32 18, %v6807_v28  ;;  %v8082_v19 = vsel %vm6416_vm0, %v6378_v17, %v6343_v29 }
 0x1f2   : > { %8054 = vst [vmem:[#allocation36_spill] sm:$0xff] %v6826_v46  ;;  %v6828_v62 = vpop.f32.mrb[16].mxu1  ;;  %vm6886_vm5 = vmand %vm8072_vm12, %vm8071_vm9  ;;  %vm8077_vm9 = vcmp.lt.s32.totalorder %v6819_v50, 0  ;;  %v6912_v51 = vsub.s32 %v6643_v44, %v3291_v40  ;;  %vm6919_vm6 = vcmp.lt.s32.totalorder %v8082_v19, 16  ;;  %v6937_v29 = vadd.s32 18, %v6819_v50  ;;  %v8134_v50 = vld [vmem:[#allocation24_spill] sm:$0xff] }
 0x1f3   : > { %8055 = vst [vmem:[#allocation37_spill] sm:$0xff] %v6828_v62  ;;  %v6835_v20 = vpop.f32.mrb[17].mxu1  ;;  %vm6905_vm12 = vmand %vm8077_vm9, %vm8076_vm1  ;;  %vm6928_vm1 = vcmp.lt.s32.totalorder %v8085_v45, 16  ;;  %vm8089_vm0 = vcmp.ne.s32.totalorder %v6826_v46, 0  ;;  %vm8090_vm9 = vcmp.lt.s32.totalorder %v6826_v46, 0  ;;  %v6948_v55 = vadd.s32 18, %v6826_v46 }
 0x1f4   : > { %8057 = vst [vmem:[#allocation39_spill] sm:$0xff] %v6835_v20  ;;  %v6842_v42 = vpop.f32.mrb[18].mxu1  ;;  %v8079_v27 = vsel %vm6905_vm12, 4294967295, %v8078_v27  ;;  %8081 = vst [vmem:[#allocation45_spill] sm:$0xff] %v6912_v51  ;;  %v6951_v23 = vsub.s32 %v6653_v43, %v3346_v22  ;;  %vm8094_vm7 = vcmp.ne.s32.totalorder %v6832_v36, 0  ;;  %vm8095_vm2 = vcmp.lt.s32.totalorder %v6832_v36, 0 }
 0x1f5   : > { %8059 = vst [vmem:[#allocation41_spill] sm:$0xff] %v6842_v42  ;;  %v6855_v9 = vpop.f32.mrb[19].mxu1  ;;  %8080 = vst [vmem:[#allocation44_spill] sm:$0xff] %v8079_v27  ;;  %v6962_v44 = vadd.s32 18, %v6832_v36  ;;  %v6965_v45 = vadd.s32 18, %v6840_v33  ;;  %v8101_v43 = vsel %vm6449_vm4, %v6400_v26, %v6362_v8  ;;  %v8102_v22 = vmov 0 }
 0x1f6   : > { %8063 = vst [vmem:[#allocation42_spill] sm:$0xff] %v6855_v9  ;;  %8088 = vst [vmem:[#allocation46_spill] sm:$0xff] %v6937_v29  ;;  %v6968_v40 = vmul.u32.u64.low 3817748708, %v6871_v38  ;;  %v6969_v19 = vmul.u32.u64.high 3817748708, %v6871_v38, %v6968_v40  ;;  %vm3472_vm13 = vcmp.ne.s32.totalorder %v6893_v52, 0  ;;  %vm3508_vm4 = vcmp.lt.s32.totalorder %v6893_v52, 0 }
 0x1f7   : > { %vm6943_vm14 = vmand %vm8090_vm9, %vm8089_vm0  ;;  %8093 = vst [vmem:[#allocation47_spill] sm:$0xff] %v6951_v23  ;;  %vm8104_vm0 = vcmp.ne.s32.totalorder %v6840_v33, 0  ;;  %vm8105_vm9 = vcmp.lt.s32.totalorder %v6840_v33, 0  ;;  %v8106_v40 = vmov 0  ;;  %v6996_v8 = vsub.s32 %v6679_v47, %v3324_v4  ;;  %v8127_v33 = vld [vmem:[#allocation14_spill] sm:$0xff]  ;;  %v8135_v29 = vld [vmem:[#allocation19_spill] sm:$0xff] }
 0x1f8   : > { %vm6957_vm3 = vmand %vm8095_vm2, %vm8094_vm7  ;;  %8099 = vst [vmem:[#allocation49_spill] sm:$0xff] %v6962_v44  ;;  %vm6977_vm2 = vcmp.lt.s32.totalorder %v8101_v43, 16  ;;  %vm3470_vm10 = vcmp.ne.s32.totalorder %v6912_v51, 0  ;;  %v7012_v47 = vadd.s32 18, %v6893_v52  ;;  %v8111_v9 = vmov 0 }
 0x1f9   : > { %v8097_v48 = vsel %vm6957_vm3, 4294967295, %v8096_v48  ;;  %8100 = vst [vmem:[#allocation50_spill] sm:$0xff] %v6965_v45  ;;  %v8103_v22 = vsel %vm6977_vm2, 4294967295, %v8102_v22  ;;  %vm6989_vm7 = vmand %vm8105_vm9, %vm8104_vm0  ;;  %vm3506_vm2 = vcmp.lt.s32.totalorder %v6912_v51, 0  ;;  %v7035_v42 = vadd.s32 18, %v6912_v51  ;;  %v8129_v45 = vld [vmem:[#allocation18_spill] sm:$0xff] }
 0x1fa   : > { %8098 = vst [vmem:[#allocation48_spill] sm:$0xff] %v8097_v48  ;;  %v8107_v40 = vsel %vm6989_vm7, 4294967295, %v8106_v40  ;;  %8109 = vst [vmem:[#allocation52_spill] sm:$0xff] %v6996_v8  ;;  %v8115_v26 = vsel %vm6491_vm11, %v6496_v30, %v6402_v41  ;;  %vm3509_vm3 = vcmp.lt.s32.totalorder %v6996_v8, 0  ;;  %vm8121_vm11 = vcmp.ne.s32.totalorder %v6951_v23, 0 }
 0x1fb   : > { %8108 = vst [vmem:[#allocation51_spill] sm:$0xff] %v8107_v40  ;;  %8110 = vst [vmem:[#allocation53_spill] sm:$0xff] %v7012_v47  ;;  %vm7043_vm0 = vcmp.lt.s32.totalorder %v8115_v26, 16  ;;  %vm8122_vm7 = vcmp.lt.s32.totalorder %v6951_v23, 0  ;;  %v8123_v30 = vmov 0  ;;  %v7074_v44 = vadd.s32 240, %v6300_v1 }
 0x1fc   : > { %v4750_v4 = vpop.f32.mrb[0].mxu0  ;;  %vm7030_vm9 = vmand %vm3508_vm4, %vm3472_vm13  ;;  %8114 = vst [vmem:[#allocation55_spill] sm:$0xff] %v7035_v42  ;;  %vm3473_vm4 = vcmp.ne.s32.totalorder %v6996_v8, 0  ;;  %v8130_v40 = vld [vmem:[#allocation11_spill] sm:$0xff]  ;;  %v8136_v27 = vsel %vm6669_vm8, %v8134_v50, %v8135_v29  ;;  %v8141_v29 = vmov 0  ;;  %v7145_v52 = vadd.s32 232, %v6300_v1 }
 0x1fd   : > { %v8112_v9 = vsel %vm7030_vm9, 4294967295, %v8111_v9  ;;  %v4786_v12 = vadd.f32 %v4750_v4, %v6428_v37  ;;  %v2837_v20 = vpop.f32.mrb[1].mxu0  ;;  %vm7051_vm13 = vmand %vm3506_vm2, %vm3470_vm10  ;;  %v7056_v37 = vadd.s32 18, %v6951_v23  ;;  %vm8128_vm10 = vnez %v8127_v33  ;;  %v8140_v50 = vld [vmem:[#allocation15_spill] sm:$0xff]  ;;  %v8154_v23 = vld [vmem:[#allocation25_spill] sm:$0xff] }
 0x1fe   : > { %8113 = vst [vmem:[#allocation54_spill] sm:$0xff] %v8112_v9  ;;  %v4787_v41 = vadd.f32 %v2837_v20, %v6443_v0  ;;  %v4751_v16 = vpop.f32.mrb[2].mxu0  ;;  %vm7065_vm12 = vmand %vm8122_vm7, %vm8121_vm11  ;;  %v7070_v26 = vmul.u32.u64.low 3817748708, %v7005_v58  ;;  %v7071_v4 = vmul.u32.u64.high 3817748708, %v7005_v58, %v7070_v26  ;;  %v8126_v0 = vld [vmem:[#allocation9_spill] sm:$0xff]  ;;  %v8131_v62 = vsel %vm8128_vm10, %v8129_v45, %v8130_v40  ;;  %v8248_v43 = vld [vmem:[#allocation42_spill] sm:$0xff] }
 0x1ff   : > { %8120 = vst [vmem:[#allocation56_spill] sm:$0xff] %v7056_v37  ;;  %v8124_v30 = vsel %vm7065_vm12, 4294967295, %v8123_v30  ;;  %3895 = vst [vmem:[%s7078_s4 + $0xe] sm:$0xfc] %v4786_v12  ;;  %v4788_v20 = vadd.f32 %v4751_v16, %v8126_v0  ;;  %v2840_v48 = vpop.f32.mrb[3].mxu0  ;;  %vm7087_vm2 = vcmp.lt.s32.totalorder %v8131_v62, 16 }
 0x200   : > { %8125 = vst [vmem:[#allocation57_spill] sm:$0xff] %v8124_v30  ;;  %vm7096_vm7 = vcmp.lt.s32.totalorder %v8136_v27, 16  ;;  %v7105_v45 = vadd.s32 18, %v6996_v8  ;;  %v7108_v62 = vadd.s32 224, %v6300_v1  ;;  %v3737_v35 = vsel %vm6878_vm15, %v4787_v41, 0.0  ;;  %3893 = vst [vmem:[%s7078_s4] sm:$0xff] %v4787_v41  ;;  %v8144_v0 = vld [vmem:[#allocation17_spill] sm:$0xff] }
 0x201   : > { %v4789_v27 = vadd.f32 %v2840_v48, %v8140_v50  ;;  %vm7118_vm8 = vmand %vm3509_vm3, %vm3473_vm4  ;;  %v3356_v40 = vshrl.u32 %v6969_v19, 4  ;;  %v7124_v16 = vadd.s32 248, %v6300_v1  ;;  %3896 = vst [vmem:[%s7078_s4 + $0x16] sm:$0xff] %v4788_v20  ;;  %vm8145_vm11 = vnez %v8144_v0  ;;  %v8147_v41 = vld [vmem:[#allocation10_spill] sm:$0xff]  ;;  %v8155_v8 = vld [vmem:[#allocation23_spill] sm:$0xff] }
 0x202   : > { %8139 = vst [vmem:[#allocation9_spill] sm:$0xff] %v7105_v45  ;;  %v8142_v29 = vsel %vm7118_vm8, 4294967295, %v8141_v29  ;;  %v8148_v33 = vsel %vm8145_vm11, %v8146_v31, %v8147_v41  ;;  %v7148_v0 = vadd.s32 272, %v6300_v1  ;;  %v3815_v47 = vmul.f32 %v3737_v35, %v3737_v35 }
 0x203   : > { %8143 = vst [vmem:[#allocation14_spill] sm:$0xff] %v8142_v29  ;;  %vm7132_vm15 = vcmp.lt.s32.totalorder %v8148_v33, 16  ;;  %v3739_v33 = vsel %vm6919_vm6, %v4786_v12, 0.0  ;;  %v3738_v31 = vsel %vm6928_vm1, %v4789_v27, 0.0  ;;  %3894 = vst [vmem:[%s7078_s4 + $0x8] sm:$0xff] %v4789_v27  ;;  %vm8151_vm3 = vnez %v8103_v22  ;;  %v8163_v29 = vld [vmem:[#allocation21_spill] sm:$0xff] }
 0x204   : > { %v7156_v41 = vmul.u32.u64.low 3817748708, %v7074_v44  ;;  %v7157_v50 = vmul.u32.u64.high 3817748708, %v7074_v44, %v7156_v41  ;;  %v3773_v30 = vadd.f32 %v3738_v31, %v3737_v35  ;;  %v3816_v19 = vmul.f32 %v3738_v31, %v3738_v31  ;;  %v4754_v12 = vpop.f32.mrb[4].mxu0  ;;  %v8152_v31 = vld [vmem:[#allocation20_spill] sm:$0xff] }
 0x205   : > { %v3740_v2 = vsel %vm8151_vm3, %v4788_v20, 0.0  ;;  %v3357_v63 = vmul.u32 18, %v3356_v40  ;;  %v7166_v27 = vmul.u32.u64.low 3817748708, %v7108_v62  ;;  %v7167_v37 = vmul.u32.u64.high 3817748708, %v7108_v62, %v7166_v27  ;;  %v2853_v42 = vpop.f32.mrb[5].mxu0  ;;  %v8159_v40 = vld [vmem:[#allocation22_spill] sm:$0xff] }
 0x206   : > { %v3817_v41 = vmul.f32 %v3739_v33, %v3739_v33  ;;  %v3774_v9 = vadd.f32 %v3773_v30, %v3739_v33  ;;  %v3851_v35 = vadd.f32 %v3816_v19, %v3815_v47  ;;  %v4790_v51 = vadd.f32 %v4754_v12, %v8152_v31  ;;  %v4755_v27 = vpop.f32.mrb[6].mxu0 }
 0x207   : > { %vm8153_vm6 = vnez %v8030_v53  ;;  %v4791_v45 = vadd.f32 %v2853_v42, %v8159_v40  ;;  %v3334_v30 = vshrl.u32 %v7071_v4, 4  ;;  %v3818_v53 = vmul.f32 %v3740_v2, %v3740_v2  ;;  %v2856_v12 = vpop.f32.mrb[7].mxu0  ;;  %v8164_v42 = vld [vmem:[#allocation8_spill] sm:$0xff] }
 0x208   : > { %v8156_v22 = vsel %vm8153_vm6, %v8154_v23, %v8155_v8  ;;  %v7182_v47 = vmul.u32.u64.low 3817748708, %v7124_v16  ;;  %v7183_v19 = vmul.u32.u64.high 3817748708, %v7124_v16, %v7182_v47  ;;  %v3852_v33 = vadd.f32 %v3851_v35, %v3817_v41  ;;  %3900 = vst [vmem:[%s7078_s4 + $0x2c] sm:$0xf] %v4790_v51  ;;  %3901 = vst [vmem:[%s7078_s4 + $0x2a] sm:$0xc0] %v4790_v51 }
 0x209   : > { %vm7175_vm1 = vcmp.lt.s32.totalorder %v8156_v22, 16  ;;  %v8160_v23 = vld [vmem:[#allocation12_spill] sm:$0xff]  ;;  %v3775_v31 = vadd.f32 %v3774_v9, %v3740_v2  ;;  %v8161_v22 = vld [vmem:[#allocation30_spill] sm:$0xff]  ;;  %vm8168_vm11 = vnez %v8039_v57  ;;  %v3741_v9 = vsel %vm7043_vm0, %v4791_v45, 0.0  ;;  %3897 = vst [vmem:[%s7078_s4 + $0x1e] sm:$0x3] %v4791_v45 }
 0x20a   : > { %v4792_v8 = vadd.f32 %v4755_v27, %v8160_v23  ;;  %vm8162_vm4 = vnez %v8161_v22  ;;  %v8169_v41 = vsel %vm8168_vm11, %v6658_v24, %v6598_v49  ;;  %3898 = vst [vmem:[%s7078_s4 + $0x1c] sm:$0xf0] %v4791_v45  ;;  %v3819_v23 = vmul.f32 %v3741_v9, %v3741_v9 }
 0x20b   : > { %v8165_v40 = vsel %vm8162_vm4, %v8163_v29, %v8164_v42  ;;  %vm7202_vm3 = vcmp.lt.s32.totalorder %v8169_v41, 16  ;;  %v8172_v29 = vld [vmem:[#allocation13_spill] sm:$0xff]  ;;  %v7212_v27 = vmul.u32.u64.low 3817748708, %v7145_v52  ;;  %v7213_v47 = vmul.u32.u64.high 3817748708, %v7145_v52, %v7212_v27 }
 0x20c   : > { %vm7193_vm10 = vcmp.lt.s32.totalorder %v8165_v40, 16  ;;  %v4793_v2 = vadd.f32 %v2856_v12, %v8172_v29  ;;  %3902 = vst [vmem:[%s7078_s4 + $0x32] sm:$0xff] %v4792_v8  ;;  %v3776_v57 = vadd.f32 %v3775_v31, %v3741_v9  ;;  %v3853_v22 = vadd.f32 %v3852_v33, %v3818_v53  ;;  %v4758_v40 = vpop.f32.mrb[8].mxu0  ;;  %v8177_v9 = vld [vmem:[#allocation26_spill] sm:$0xff] }
 0x20d   : > { %vm8173_vm6 = vnez %v8034_v32  ;;  %v7226_v36 = vadd.s32 256, %v6300_v1  ;;  %v3743_v45 = vsel %vm7087_vm2, %v4790_v51, 0.0  ;;  %v7234_v53 = vsub.s32 %v6871_v38, %v3357_v63 }
 0x20e   : > { %v8174_v24 = vsel %vm8173_vm6, %v6626_v39, %v6562_v13  ;;  %v3742_v12 = vsel %vm7096_vm7, %v4793_v2, 0.0  ;;  %3899 = vst [vmem:[%s7078_s4 + $0x24] sm:$0xff] %v4793_v2  ;;  %v7237_v32 = vadd.s32 280, %v6300_v1  ;;  %v3854_v33 = vadd.f32 %v3853_v22, %v3819_v23  ;;  %v2869_v2 = vpop.f32.mrb[9].mxu0 }
 0x20f   : > { %vm7221_vm4 = vcmp.lt.s32.totalorder %v8174_v24, 16  ;;  %v3777_v13 = vadd.f32 %v3776_v57, %v3742_v12  ;;  %v3820_v39 = vmul.f32 %v3742_v12, %v3742_v12  ;;  %v3335_v31 = vmul.u32 18, %v3334_v30  ;;  %v4759_v27 = vpop.f32.mrb[10].mxu0 }
 0x210   : > { %v3744_v42 = vsel %vm7132_vm15, %v4792_v8, 0.0  ;;  %v3389_v51 = vshrl.u32 %v7157_v50, 4  ;;  %v7243_v46 = vmul.u32.u64.low 3817748708, %v7148_v0  ;;  %v7244_v26 = vmul.u32.u64.high 3817748708, %v7148_v0, %v7243_v46  ;;  %v8182_v50 = vld [vmem:[#allocation27_spill] sm:$0xff]  ;;  %v2872_v24 = vpop.f32.mrb[11].mxu0 }
 0x211   : > { %v3821_v38 = vmul.f32 %v3743_v45, %v3743_v45  ;;  %v3778_v63 = vadd.f32 %v3777_v13, %v3743_v45  ;;  %v3855_v41 = vadd.f32 %v3854_v33, %v3820_v39  ;;  %v4794_v29 = vadd.f32 %v4758_v40, %v8177_v9  ;;  %v8192_v39 = vld [vmem:[#allocation29_spill] sm:$0xff] }
 0x212   : > { %vm8178_vm0 = vnez %v8048_v3  ;;  %v4795_v8 = vadd.f32 %v2869_v2, %v8182_v50  ;;  %vm3476_vm7 = vcmp.ne.s32.totalorder %v7234_v53, 0  ;;  %v3367_v23 = vshrl.u32 %v7167_v37, 4 }
 0x213   : > { %v8179_v48 = vsel %vm8178_vm0, %v6768_v25, %v6650_v6  ;;  %v3822_v57 = vmul.f32 %v3744_v42, %v3744_v42  ;;  %v3856_v3 = vadd.f32 %v3855_v41, %v3821_v38  ;;  %3905 = vst [vmem:[%s7078_s4 + $0x48] sm:$0xff] %v4794_v29  ;;  %v3779_v22 = vadd.f32 %v3778_v63, %v3744_v42  ;;  %v8183_v25 = vld [vmem:[#allocation28_spill] sm:$0xff] }
 0x214   : > { %vm7253_vm2 = vcmp.lt.s32.totalorder %v8179_v48, 16  ;;  %v4796_v6 = vadd.f32 %v4759_v27, %v8183_v25  ;;  %vm8184_vm11 = vnez %v8044_v54  ;;  %vm8188_vm0 = vnez %v8062_v15  ;;  %3903 = vst [vmem:[%s7078_s4 + $0x3a] sm:$0x3f] %v4795_v8 }
 0x215   : > { %v8185_v45 = vsel %vm8184_vm11, %v6750_v5, %v6617_v11  ;;  %v8189_v37 = vsel %vm8188_vm0, %v6851_v56, %v6788_v61  ;;  %v3745_v54 = vsel %vm7175_vm1, %v4795_v8, 0.0  ;;  %v4797_v11 = vadd.f32 %v2872_v24, %v8192_v39  ;;  %v8204_v8 = vld [vmem:[#allocation32_spill] sm:$0xff]  ;;  %v8227_v56 = vld [vmem:[#allocation50_spill] sm:$0xff] }
 0x216   : > { %vm7268_vm6 = vcmp.lt.s32.totalorder %v8185_v45, 16  ;;  %vm7277_vm15 = vcmp.lt.s32.totalorder %v8189_v37, 16  ;;  %v7286_v5 = vadd.s32 18, %v7234_v53  ;;  %v7289_v33 = vsub.s32 %v7005_v58, %v3335_v31  ;;  %3906 = vst [vmem:[%s7078_s4 + $0x4e] sm:$0xfc] %v4796_v6 }
 0x217   : > { %v3780_v15 = vadd.f32 %v3779_v22, %v3745_v54  ;;  %v3823_v42 = vmul.f32 %v3745_v54, %v3745_v54  ;;  %v3857_v40 = vadd.f32 %v3856_v3, %v3822_v57  ;;  %vm8193_vm11 = vnez %v8052_v21  ;;  %3904 = vst [vmem:[%s7078_s4 + $0x40] sm:$0xff] %v4797_v11  ;;  %v8205_v22 = vld [vmem:[#allocation33_spill] sm:$0xff] }
 0x218   : > { %v8194_v61 = vsel %vm8193_vm11, %v6771_v14, %v6662_v59  ;;  %v3390_v20 = vmul.u32 18, %v3389_v51  ;;  %v3747_v46 = vsel %vm7193_vm10, %v4794_v29, 0.0  ;;  %v3746_v58 = vsel %vm7202_vm3, %v4797_v11, 0.0  ;;  %v4762_v51 = vpop.f32.mrb[12].mxu0  ;;  %v8200_v29 = vld [vmem:[#allocation31_spill] sm:$0xff] }
 0x219   : > { %vm7297_vm0 = vcmp.lt.s32.totalorder %v8194_v61, 16  ;;  %v3400_v31 = vshrl.u32 %v7183_v19, 4  ;;  %v7308_v38 = vadd.s32 264, %v6300_v1  ;;  %v3858_v21 = vadd.f32 %v3857_v40, %v3823_v42  ;;  %v2885_v48 = vpop.f32.mrb[13].mxu0  ;;  %v8217_v40 = vld [vmem:[#allocation44_spill] sm:$0xff]  ;;  %v8219_v61 = vld [vmem:[#allocation46_spill] sm:$0xff] }
 0x21a   : > { %v3781_v63 = vadd.f32 %v3780_v15, %v3746_v58  ;;  %v3824_v59 = vmul.f32 %v3746_v58, %v3746_v58  ;;  %vm8197_vm1 = vcmp.lt.s32.totalorder %v7234_v53, 0  ;;  %v3368_v4 = vmul.u32 18, %v3367_v23  ;;  %v4763_v23 = vpop.f32.mrb[14].mxu0  ;;  %v7381_v42 = vpop.f32.mrb[20].mxu1  ;;  %v8256_v58 = vld [vmem:[#allocation9_spill] sm:$0xff] }
 0x21b   : > { %vm7314_vm11 = vmand %vm8197_vm1, %vm3476_vm7  ;;  %v3748_v35 = vsel %vm7221_vm4, %v4796_v6, 0.0  ;;  %vm3474_vm10 = vcmp.ne.s32.totalorder %v7289_v33, 0  ;;  %vm3510_vm3 = vcmp.lt.s32.totalorder %v7289_v33, 0  ;;  %v3378_v1 = vshrl.u32 %v7213_v47, 4  ;;  %v2888_v6 = vpop.f32.mrb[15].mxu0 }
 0x21c   : > { %v3825_v19 = vmul.f32 %v3747_v46, %v3747_v46  ;;  %v3782_v41 = vadd.f32 %v3781_v63, %v3747_v46  ;;  %v3859_v9 = vadd.f32 %v3858_v21, %v3824_v59  ;;  %v4798_v2 = vadd.f32 %v4762_v51, %v8200_v29  ;;  %v7398_v63 = vpop.f32.mrb[21].mxu1 }
 0x21d   : > { %v8201_v49 = vsel %vm6886_vm5, %v6899_v18, %v6807_v28  ;;  %v4799_v27 = vadd.f32 %v2885_v48, %v8204_v8  ;;  %v3620_v47 = vsel %vm7314_vm11, %v7286_v5, %v7234_v53  ;;  %v7339_v57 = vadd.s32 18, %v7289_v33 }
 0x21e   : > { %vm7329_vm4 = vcmp.lt.s32.totalorder %v8201_v49, 16  ;;  %v7342_v7 = vsub.s32 %v7074_v44, %v3390_v20  ;;  %v3826_v28 = vmul.f32 %v3748_v35, %v3748_v35  ;;  %v3860_v18 = vadd.f32 %v3859_v9, %v3825_v19  ;;  %3910 = vst [vmem:[%s7078_s4 + $0x64] sm:$0xff] %v4798_v2  ;;  %v8210_v44 = vld [vmem:[#allocation36_spill] sm:$0xff]  ;;  %v8220_v20 = vld [vmem:[#allocation35_spill] sm:$0xff]  ;;  %v8224_v49 = vld [vmem:[#allocation37_spill] sm:$0xff] }
 0x21f   : > { %v3783_v3 = vadd.f32 %v3782_v41, %v3748_v35  ;;  %v4800_v25 = vadd.f32 %v4763_v23, %v8205_v22  ;;  %vm8206_vm5 = vnez %v8067_v34  ;;  %v8211_v37 = vsel %vm6943_vm14, %v6948_v55, %v8210_v44  ;;  %3907 = vst [vmem:[%s7078_s4 + $0x56] sm:$0xff] %v4799_v27  ;;  %v8214_v34 = vld [vmem:[#allocation34_spill] sm:$0xff]  ;;  %v7404_v41 = vpop.f32.mrb[22].mxu1 }
 0x220   : > { %v8207_v24 = vsel %vm8206_vm5, %v6866_v60, %v6791_v10  ;;  %vm7360_vm1 = vcmp.lt.s32.totalorder %v8211_v37, 16  ;;  %v3749_v39 = vsel %vm7253_vm2, %v4799_v27, 0.0  ;;  %v4801_v10 = vadd.f32 %v2888_v6, %v8214_v34  ;;  %vm7372_vm5 = vmand %vm3510_vm3, %vm3474_vm10  ;;  %v7412_v9 = vpop.f32.mrb[23].mxu1 }
 0x221   : > { %vm7351_vm7 = vcmp.lt.s32.totalorder %v8207_v24, 16  ;;  %v7377_v17 = vsub.s32 %v7108_v62, %v3368_v4  ;;  %v3401_v55 = vmul.u32 18, %v3400_v31  ;;  %v3784_v11 = vadd.f32 %v3783_v3, %v3749_v39  ;;  %3911 = vst [vmem:[%s7078_s4 + $0x6c] sm:$0xf] %v4800_v25  ;;  %3912 = vst [vmem:[%s7078_s4 + $0x6a] sm:$0xc0] %v4800_v25 }
 0x222   : > { %v3827_v30 = vmul.f32 %v3749_v39, %v3749_v39  ;;  %v3861_v15 = vadd.f32 %v3860_v18, %v3826_v28  ;;  %vm8218_vm14 = vnez %v8217_v40  ;;  %v3379_v21 = vmul.u32 18, %v3378_v1  ;;  %3908 = vst [vmem:[%s7078_s4 + $0x5e] sm:$0x3] %v4801_v10  ;;  %3909 = vst [vmem:[%s7078_s4 + $0x5c] sm:$0xf0] %v4801_v10  ;;  %v4766_v1 = vpop.f32.mrb[16].mxu0 }
 0x223   : > { %v8221_v46 = vsel %vm8218_vm14, %v8219_v61, %v8220_v20  ;;  %v3751_v62 = vsel %vm7268_vm6, %v4798_v2, 0.0  ;;  %v3750_v31 = vsel %vm7277_vm15, %v4801_v10, 0.0  ;;  %v3618_v12 = vsel %vm7372_vm5, %v7339_v57, %v7289_v33  ;;  %v2901_v27 = vpop.f32.mrb[17].mxu0  ;;  %v8225_v28 = vld [vmem:[#allocation51_spill] sm:$0xff]  ;;  %v8228_v18 = vld [vmem:[#allocation40_spill] sm:$0xff]  ;;  %v8236_v61 = vld [vmem:[#allocation49_spill] sm:$0xff] }
 0x224   : > { %vm7388_vm2 = vcmp.lt.s32.totalorder %v8221_v46, 16  ;;  %v7401_v59 = vmul.u32.u64.low 3817748708, %v7226_v36  ;;  %v7402_v4 = vmul.u32.u64.high 3817748708, %v7226_v36, %v7401_v59  ;;  %v3862_v35 = vadd.f32 %v3861_v15, %v3827_v30  ;;  %v4767_v6 = vpop.f32.mrb[18].mxu0  ;;  %v8234_v40 = vld [vmem:[#allocation48_spill] sm:$0xff]  ;;  %v8237_v20 = vld [vmem:[#allocation38_spill] sm:$0xff] }
 0x225   : > { %v3785_v51 = vadd.f32 %v3784_v11, %v3750_v31  ;;  %v3828_v19 = vmul.f32 %v3750_v31, %v3750_v31  ;;  %v3752_v13 = vsel %vm7297_vm0, %v4800_v25, 0.0  ;;  %vm3477_vm15 = vcmp.ne.s32.totalorder %v7377_v17, 0  ;;  %v8233_v11 = vld [vmem:[#allocation41_spill] sm:$0xff]  ;;  %v2904_v15 = vpop.f32.mrb[19].mxu0 }
 0x226   : > { %vm3513_vm6 = vcmp.lt.s32.totalorder %v7377_v17, 0  ;;  %v3433_v29 = vshrl.u32 %v7244_v26, 4  ;;  %v3829_v2 = vmul.f32 %v3751_v62, %v3751_v62  ;;  %v4802_v8 = vadd.f32 %v4766_v1, %v8224_v49  ;;  %v8232_v26 = vld [vmem:[#allocation39_spill] sm:$0xff]  ;;  %v4770_v54 = vpop.f32.mrb[20].mxu0 }
 0x227   : > { %v3863_v48 = vadd.f32 %v3862_v35, %v3828_v19  ;;  %v3786_v23 = vadd.f32 %v3785_v51, %v3751_v62  ;;  %vm8226_vm10 = vnez %v8225_v28  ;;  %v4803_v25 = vadd.f32 %v2901_v27, %v8232_v26  ;;  %vm7463_vm11 = vmand %vm3513_vm6, %vm3477_vm15  ;;  %v7476_v27 = vpop.f32.mrb[24].mxu1  ;;  %v8250_v28 = vld [vmem:[#allocation53_spill] sm:$0xff] }
 0x228   : > { %v8229_v3 = vsel %vm8226_vm10, %v8227_v56, %v8228_v18  ;;  %v7431_v24 = vadd.s32 18, %v7342_v7  ;;  %v7434_v44 = vadd.s32 18, %v7377_v17  ;;  %v7437_v37 = vsub.s32 %v7124_v16, %v3401_v55  ;;  %3915 = vst [vmem:[%s7078_s4 + $0x80] sm:$0xff] %v4802_v8  ;;  %v8241_v16 = vld [vmem:[#allocation55_spill] sm:$0xff]  ;;  %v8242_v55 = vld [vmem:[#allocation45_spill] sm:$0xff] }
 0x229   : > { %vm7423_vm0 = vcmp.lt.s32.totalorder %v8229_v3, 16  ;;  %v3830_v39 = vmul.f32 %v3752_v13, %v3752_v13  ;;  %v3787_v34 = vadd.f32 %v3786_v23, %v3752_v13  ;;  %v3864_v10 = vadd.f32 %v3863_v48, %v3829_v2  ;;  %3913 = vst [vmem:[%s7078_s4 + $0x72] sm:$0xff] %v4803_v25  ;;  %v8251_v56 = vld [vmem:[#allocation43_spill] sm:$0xff] }
 0x22a   : > { %v4804_v30 = vadd.f32 %v4767_v6, %v8233_v11  ;;  %vm8235_vm10 = vnez %v8234_v40  ;;  %v8243_v31 = vsel %vm7051_vm13, %v8241_v16, %v8242_v55  ;;  %v3753_v51 = vsel %vm7329_vm4, %v4803_v25, 0.0  ;;  %v7495_v6 = vpop.f32.mrb[25].mxu1  ;;  %v2917_v16 = vpop.f32.mrb[21].mxu0 }
 0x22b   : > { %v8238_v46 = vsel %vm8235_vm10, %v8236_v61, %v8237_v20  ;;  %vm7455_vm3 = vcmp.lt.s32.totalorder %v8243_v31, 16  ;;  %v4805_v19 = vadd.f32 %v2904_v15, %v8248_v43  ;;  %v3788_v2 = vadd.f32 %v3787_v34, %v3753_v51 }
 0x22c   : > { %vm7446_vm14 = vcmp.lt.s32.totalorder %v8238_v46, 16  ;;  %v7472_v13 = vmul.u32.u64.low 3817748708, %v7308_v38  ;;  %v7473_v1 = vmul.u32.u64.high 3817748708, %v7308_v38, %v7472_v13  ;;  %v3831_v48 = vmul.f32 %v3753_v51, %v3753_v51  ;;  %3916 = vst [vmem:[%s7078_s4 + $0x88] sm:$0xff] %v4804_v30 }
 0x22d   : > { %v3865_v49 = vadd.f32 %v3864_v10, %v3830_v39  ;;  %v8252_v18 = vsel %vm7030_vm9, %v8250_v28, %v8251_v56  ;;  %v7488_v3 = vsub.s32 %v7145_v52, %v3379_v21  ;;  %v3755_v26 = vsel %vm7351_vm7, %v4802_v8, 0.0  ;;  %3914 = vst [vmem:[%s7078_s4 + $0x7a] sm:$0x3f] %v4805_v19  ;;  %v7501_v52 = vpop.f32.mrb[26].mxu1 }
 0x22e   : > { %vm7483_vm13 = vcmp.lt.s32.totalorder %v8252_v18, 16  ;;  %v3754_v25 = vsel %vm7360_vm1, %v4805_v19, 0.0  ;;  %v3621_v39 = vsel %vm7463_vm11, %v7434_v44, %v7377_v17  ;;  %v3434_v34 = vmul.u32 18, %v3433_v29  ;;  %v7506_v21 = vpop.f32.mrb[27].mxu1  ;;  %v4771_v19 = vpop.f32.mrb[22].mxu0  ;;  %v8263_v18 = vld [vmem:[#allocation47_spill] sm:$0xff] }
 0x22f   : > { %v3866_v10 = vadd.f32 %v3865_v49, %v3831_v48  ;;  %v3789_v11 = vadd.f32 %v3788_v2, %v3754_v25  ;;  %v3832_v15 = vmul.f32 %v3754_v25, %v3754_v25  ;;  %vm3480_vm9 = vcmp.ne.s32.totalorder %v7437_v37, 0  ;;  %v2920_v28 = vpop.f32.mrb[23].mxu0 }
 0x230   : > { %v3756_v45 = vsel %vm7388_vm2, %v4804_v30, 0.0  ;;  %vm3516_vm4 = vcmp.lt.s32.totalorder %v7437_v37, 0  ;;  %v7510_v8 = vmul.u32.u64.low 3817748708, %v7237_v32  ;;  %v7511_v29 = vmul.u32.u64.high 3817748708, %v7237_v32, %v7510_v8  ;;  %v8257_v30 = vld [vmem:[#allocation52_spill] sm:$0xff] }
 0x231   : > { %v3833_v40 = vmul.f32 %v3755_v26, %v3755_v26  ;;  %v3790_v61 = vadd.f32 %v3789_v11, %v3755_v26  ;;  %v3867_v20 = vadd.f32 %v3866_v10, %v3832_v15  ;;  %v4806_v46 = vadd.f32 %v4770_v54, %v7381_v42  ;;  %v7565_v11 = vpop.f32.mrb[28].mxu1 }
 0x232   : > { %v8258_v31 = vsel %vm7118_vm8, %v8256_v58, %v8257_v30  ;;  %v4807_v43 = vadd.f32 %v2917_v16, %v7398_v63  ;;  %v7525_v13 = vadd.s32 18, %v7437_v37  ;;  %vm3478_vm1 = vcmp.ne.s32.totalorder %v7488_v3, 0  ;;  %v8262_v63 = vld [vmem:[#allocation56_spill] sm:$0xff]  ;;  %v7592_v5 = vpop.f32.mrb[29].mxu1 }
 0x233   : > { %vm7519_vm7 = vcmp.lt.s32.totalorder %v8258_v31, 16  ;;  %v3411_v42 = vshrl.u32 %v7402_v4, 4  ;;  %v3834_v2 = vmul.f32 %v3756_v45, %v3756_v45  ;;  %v3868_v48 = vadd.f32 %v3867_v20, %v3833_v40  ;;  %3919 = vst [vmem:[%s7078_s4 + $0x9e] sm:$0x3] %v4806_v46  ;;  %3920 = vst [vmem:[%s7078_s4 + $0x9c] sm:$0xf0] %v4806_v46 }
 0x234   : > { %v3791_v49 = vadd.f32 %v3790_v61, %v3756_v45  ;;  %v4808_v23 = vadd.f32 %v4771_v19, %v7404_v41  ;;  %v8264_v26 = vsel %vm7065_vm12, %v8262_v63, %v8263_v18  ;;  %vm7546_vm2 = vcmp.lt.s32.totalorder %v3618_v12, 16  ;;  %3917 = vst [vmem:[%s7078_s4 + $0x8e] sm:$0xfc] %v4807_v43  ;;  %v7597_v61 = vpop.f32.mrb[30].mxu1 }
 0x235   : > { %vm7537_vm8 = vcmp.lt.s32.totalorder %v8264_v26, 16  ;;  %v3757_v41 = vsel %vm7423_vm0, %v4807_v43, 0.0  ;;  %v4809_v10 = vadd.f32 %v2920_v28, %v7412_v9  ;;  %vm8269_vm12 = vcmp.ne.s32.totalorder %v7342_v7, 0  ;;  %v7613_v20 = vpop.f32.mrb[31].mxu1 }
 0x236   : > { %vm8270_vm15 = vcmp.lt.s32.totalorder %v7342_v7, 0  ;;  %vm3514_vm5 = vcmp.lt.s32.totalorder %v7488_v3, 0  ;;  %v3422_v33 = vshrl.u32 %v7473_v1, 4  ;;  %v3792_v57 = vadd.f32 %v3791_v49, %v3757_v41  ;;  %3921 = vst [vmem:[%s7078_s4 + $0xa4] sm:$0xff] %v4808_v23  ;;  %v7654_v49 = vpop.f32.mrb[32].mxu1 }
 0x237   : > { %vm7558_vm6 = vmand %vm8270_vm15, %vm8269_vm12  ;;  %v3835_v12 = vmul.f32 %v3757_v41, %v3757_v41  ;;  %v3869_v22 = vadd.f32 %v3868_v48, %v3834_v2  ;;  %vm7572_vm10 = vcmp.lt.s32.totalorder %v3620_v47, 16  ;;  %v7585_v15 = vadd.s32 18, %v7488_v3  ;;  %3918 = vst [vmem:[%s7078_s4 + $0x96] sm:$0xff] %v4809_v10 }
 0x238   : > { %vm7580_vm12 = vmand %vm3516_vm4, %vm3480_vm9  ;;  %v3759_v14 = vsel %vm7446_vm14, %v4806_v46, 0.0  ;;  %v3758_v53 = vsel %vm7455_vm3, %v4809_v10, 0.0  ;;  %v7595_v47 = vsub.s32 %v7148_v0, %v3434_v34  ;;  %v3412_v45 = vmul.u32 18, %v3411_v42  ;;  %v4774_v34 = vpop.f32.mrb[24].mxu0 }
 0x239   : > { %v3870_v54 = vadd.f32 %v3869_v22, %v3835_v12  ;;  %v3793_v8 = vadd.f32 %v3792_v57, %v3758_v53  ;;  %v3836_v40 = vmul.f32 %v3758_v53, %v3758_v53  ;;  %v3623_v62 = vsel %vm7558_vm6, %v7431_v24, %v7342_v7  ;;  %vm7607_vm3 = vmand %vm3514_vm5, %vm3478_vm1  ;;  %v2933_v50 = vpop.f32.mrb[25].mxu0 }
 0x23a   : > { %v3760_v0 = vsel %vm7483_vm13, %v4808_v23, 0.0  ;;  %v3624_v46 = vsel %vm7580_vm12, %v7525_v13, %v7437_v37  ;;  %v3444_v7 = vshrl.u32 %v7511_v29, 4  ;;  %v3423_v24 = vmul.u32 18, %v3422_v33  ;;  %v4775_v29 = vpop.f32.mrb[26].mxu0 }
 0x23b   : > { %v3837_v16 = vmul.f32 %v3759_v14, %v3759_v14  ;;  %v3794_v55 = vadd.f32 %v3793_v8, %v3759_v14  ;;  %v3871_v58 = vadd.f32 %v3870_v54, %v3836_v40  ;;  %v4810_v30 = vadd.f32 %v4774_v34, %v7476_v27  ;;  %v2936_v43 = vpop.f32.mrb[27].mxu0 }
 0x23c   : > { %vm7626_vm14 = vcmp.lt.s32.totalorder %v3621_v39, 16  ;;  %v4811_v37 = vadd.f32 %v2933_v50, %v7495_v6  ;;  %v3622_v27 = vsel %vm7607_vm3, %v7585_v15, %v7488_v3  ;;  %vm3483_vm13 = vcmp.ne.s32.totalorder %v7595_v47, 0  ;;  %v4778_v41 = vpop.f32.mrb[28].mxu0 }
 0x23d   : > { %v7637_v35 = vsub.s32 %v7226_v36, %v3412_v45  ;;  %v3838_v17 = vmul.f32 %v3760_v0, %v3760_v0  ;;  %v3872_v44 = vadd.f32 %v3871_v58, %v3837_v16  ;;  %3925 = vst [vmem:[%s7078_s4 + $0xba] sm:$0x3f] %v4810_v30  ;;  %v4812_v39 = vadd.f32 %v4775_v29, %v7501_v52  ;;  %v2949_v22 = vpop.f32.mrb[29].mxu0 }
 0x23e   : > { %v3795_v19 = vadd.f32 %v3794_v55, %v3760_v0  ;;  %vm7641_vm11 = vcmp.lt.s32.totalorder %v3623_v62, 16  ;;  %v3761_v3 = vsel %vm7519_vm7, %v4811_v37, 0.0  ;;  %3922 = vst [vmem:[%s7078_s4 + $0xac] sm:$0xf] %v4811_v37  ;;  %3923 = vst [vmem:[%s7078_s4 + $0xaa] sm:$0xc0] %v4811_v37  ;;  %v4813_v36 = vadd.f32 %v2936_v43, %v7506_v21 }
 0x23f   : > { %v3445_v13 = vmul.u32 18, %v3444_v7  ;;  %v7651_v42 = vsub.s32 %v7308_v38, %v3423_v24  ;;  %v3839_v2 = vmul.f32 %v3761_v3, %v3761_v3  ;;  %3926 = vst [vmem:[%s7078_s4 + $0xc0] sm:$0xff] %v4812_v39  ;;  %v3873_v48 = vadd.f32 %v3872_v44, %v3838_v17  ;;  %v7666_v38 = vpop.f32.mrb[33].mxu1  ;;  %v4779_v1 = vpop.f32.mrb[30].mxu0 }
 0x240   : > { %v3796_v52 = vadd.f32 %v3795_v19, %v3761_v3  ;;  %vm7656_vm9 = vcmp.lt.s32.totalorder %v3624_v46, 16  ;;  %vm3519_vm4 = vcmp.lt.s32.totalorder %v7595_v47, 0  ;;  %v3763_v51 = vsel %vm7537_vm8, %v4810_v30, 0.0  ;;  %3924 = vst [vmem:[%s7078_s4 + $0xb2] sm:$0xff] %v4813_v36  ;;  %v7670_v18 = vpop.f32.mrb[34].mxu1  ;;  %v2952_v8 = vpop.f32.mrb[31].mxu0 }
 0x241   : > { %v3762_v21 = vsel %vm7546_vm2, %v4813_v36, 0.0  ;;  %vm3481_vm7 = vcmp.ne.s32.totalorder %v7637_v35, 0  ;;  %vm3517_vm1 = vcmp.lt.s32.totalorder %v7637_v35, 0  ;;  %v3874_v63 = vadd.f32 %v3873_v48, %v3839_v2  ;;  %v7675_v4 = vpop.f32.mrb[35].mxu1  ;;  %vm7704_vm5 = vmand %vm3519_vm4, %vm3483_vm13  ;;  %v4782_v29 = vpop.f32.mrb[32].mxu0 }
 0x242   : > { %v3797_v28 = vadd.f32 %v3796_v52, %v3762_v21  ;;  %v3840_v56 = vmul.f32 %v3762_v21, %v3762_v21  ;;  %v3589_v26 = vadd.s32 18, %v7637_v35  ;;  %v3764_v25 = vsel %vm7572_vm10, %v4812_v39, 0.0  ;;  %vm7693_vm6 = vmand %vm3517_vm1, %vm3481_vm7  ;;  %v2965_v43 = vpop.f32.mrb[33].mxu0 }
 0x243   : > { %v7678_v10 = vsub.s32 %v7237_v32, %v3445_v13  ;;  %vm3482_vm8 = vcmp.ne.s32.totalorder %v7651_v42, 0  ;;  %vm3518_vm2 = vcmp.lt.s32.totalorder %v7651_v42, 0  ;;  %v3841_v60 = vmul.f32 %v3763_v51, %v3763_v51  ;;  %v4783_v3 = vpop.f32.mrb[34].mxu0 }
 0x244   : > { %v3798_v33 = vadd.f32 %v3797_v28, %v3763_v51  ;;  %v3875_v57 = vadd.f32 %v3874_v63, %v3840_v56  ;;  %v4814_v12 = vadd.f32 %v4778_v41, %v7565_v11  ;;  %v4815_v9 = vadd.f32 %v2949_v22, %v7592_v5  ;;  %vm7718_vm12 = vmand %vm3518_vm2, %vm3482_vm8 }
 0x245   : > { %vm7684_vm15 = vcmp.lt.s32.totalorder %v3622_v27, 16  ;;  %v3591_v32 = vadd.s32 18, %v7595_v47  ;;  %v3590_v11 = vadd.s32 18, %v7651_v42  ;;  %v3842_v53 = vmul.f32 %v3764_v25, %v3764_v25 }
 0x246   : > { %v3876_v5 = vadd.f32 %v3875_v57, %v3841_v60  ;;  %3929 = vst [vmem:[%s7078_s4 + $0xd6] sm:$0xff] %v4814_v12  ;;  %v3799_v45 = vadd.f32 %v3798_v33, %v3764_v25  ;;  %v4816_v54 = vadd.f32 %v4779_v1, %v7597_v61  ;;  %v3765_v62 = vsel %vm7626_vm14, %v4815_v9, 0.0  ;;  %3927 = vst [vmem:[%s7078_s4 + $0xc8] sm:$0xff] %v4815_v9 }
 0x247   : > { %v4817_v59 = vadd.f32 %v2952_v8, %v7613_v20  ;;  %vm3484_vm0 = vcmp.ne.s32.totalorder %v7678_v10, 0  ;;  %vm3520_vm10 = vcmp.lt.s32.totalorder %v7678_v10, 0  ;;  %v3843_v34 = vmul.f32 %v3765_v62, %v3765_v62 }
 0x248   : > { %v3800_v0 = vadd.f32 %v3799_v45, %v3765_v62  ;;  %v3877_v46 = vadd.f32 %v3876_v5, %v3842_v53  ;;  %3930 = vst [vmem:[%s7078_s4 + $0xde] sm:$0x3] %v4816_v54  ;;  %3931 = vst [vmem:[%s7078_s4 + $0xdc] sm:$0xf0] %v4816_v54  ;;  %v3625_v20 = vsel %vm7693_vm6, %v3589_v26, %v7637_v35  ;;  %v3767_v7 = vsel %vm7641_vm11, %v4814_v12, 0.0 }
 0x249   : > { %v3766_v24 = vsel %vm7684_vm15, %v4817_v59, 0.0  ;;  %3928 = vst [vmem:[%s7078_s4 + $0xce] sm:$0xfc] %v4817_v59  ;;  %v3627_v16 = vsel %vm7704_vm5, %v3591_v32, %v7595_v47  ;;  %v3592_v55 = vadd.s32 18, %v7678_v10  ;;  %vm7740_vm3 = vmand %vm3520_vm10, %vm3484_vm0  ;;  %v3626_v37 = vsel %vm7718_vm12, %v3590_v11, %v7651_v42 }
 0x24a   : > { %v3878_v58 = vadd.f32 %v3877_v46, %v3843_v34  ;;  %v3801_v30 = vadd.f32 %v3800_v0, %v3766_v24  ;;  %v3844_v50 = vmul.f32 %v3766_v24, %v3766_v24  ;;  %v3768_v47 = vsel %vm7656_vm9, %v4816_v54, 0.0 }
 0x24b   : > { %vm7749_vm14 = vcmp.lt.s32.totalorder %v3625_v20, 16  ;;  %v3845_v35 = vmul.f32 %v3767_v7, %v3767_v7  ;;  %v4818_v39 = vadd.f32 %v4782_v29, %v7654_v49  ;;  %vm7756_vm13 = vcmp.lt.s32.totalorder %v3627_v16, 16  ;;  %v2968_v49 = vpop.f32.mrb[35].mxu0 }
 0x24c   : > { %v3802_v17 = vadd.f32 %v3801_v30, %v3767_v7  ;;  %v3879_v44 = vadd.f32 %v3878_v58, %v3844_v50  ;;  %v4819_v6 = vadd.f32 %v2965_v43, %v7666_v38  ;;  %v3628_v36 = vsel %vm7740_vm3, %v3592_v55, %v7678_v10 }
 0x24d   : > { %vm7764_vm11 = vcmp.lt.s32.totalorder %v3626_v37, 16  ;;  %v3846_v42 = vmul.f32 %v3768_v47, %v3768_v47  ;;  %3935 = vst [vmem:[%s7078_s4 + $0xf2] sm:$0xff] %v4818_v39  ;;  %v4820_v48 = vadd.f32 %v4783_v3, %v7670_v18  ;;  %v4821_v51 = vadd.f32 %v2968_v49, %v7675_v4 }
 0x24e   : > { %v3880_v2 = vadd.f32 %v3879_v44, %v3845_v35  ;;  %v3803_v52 = vadd.f32 %v3802_v17, %v3768_v47  ;;  %v3769_v23 = vsel %vm7749_vm14, %v4819_v6, 0.0  ;;  %3932 = vst [vmem:[%s7078_s4 + $0xe4] sm:$0xff] %v4819_v6  ;;  %vm7781_vm9 = vcmp.lt.s32.totalorder %v3628_v36, 16 }
 0x24f   : > { %v3847_v38 = vmul.f32 %v3769_v23, %v3769_v23  ;;  %3936 = vst [vmem:[%s7078_s4 + $0xfa] sm:$0x3f] %v4820_v48  ;;  %v3771_v63 = vsel %vm7756_vm13, %v4818_v39, 0.0  ;;  %v3770_v18 = vsel %vm7764_vm11, %v4821_v51, 0.0  ;;  %3933 = vst [vmem:[%s7078_s4 + $0xec] sm:$0xf] %v4821_v51 }
 0x250   : > { %v3804_v21 = vadd.f32 %v3803_v52, %v3769_v23  ;;  %v3881_v28 = vadd.f32 %v3880_v2, %v3846_v42  ;;  %3934 = vst [vmem:[%s7078_s4 + $0xea] sm:$0xc0] %v4821_v51  ;;  %v3848_v41 = vmul.f32 %v3770_v18, %v3770_v18 }
 0x252   : > { %v3882_v26 = vadd.f32 %v3881_v28, %v3847_v38  ;;  %v3805_v25 = vadd.f32 %v3804_v21, %v3770_v18 }
 0x253   : > { %5239 = shalt.err (!%p5236_p3)
}
 0x254   : > { %s5240_s24 = scalar_lea.hbm %s7773_s9, 4096  ;;  %s5244_s27 = scalar_lea.hbm %s7868_s2, 8192 }
 0x255   : > { %p5241_p4 = scmp.ne.s32.totalorder %s7773_s9, %s5240_s24  ;;  %p5245_p9 = scmp.lt.u32.totalorder %s7773_s9, %s7868_s2 }
 0x256   : > { %p5246_p10 = scmp.lt.u32.totalorder %s5244_s27, %s5240_s24  ;;  %p5248_p12 = scmp.lt.u32.totalorder %s5240_s24, %s7773_s9 }
 0x257   : > { %p5242_p7 = pnand %p5241_p4, %p5384_p5 }
 0x258   : > { %p5247_p11 = por %p5246_p10, %p5245_p9 }
 0x259   : > { %p5243_p8 = pneg %p5242_p7 }
 0x25a   : > { %p5249_p13 = por %p5248_p12, %p5247_p11 }
 0x25c   : > { %p5250_p0 = pnand %p5249_p13, %p5243_p8 }
 0x25e   : > { %5253 = shalt.err (!%p5250_p0)
}
 0x25f   : > { %s5323_s4 = smov 128   ;;  %s5324_s5 = smov 8   ;;  %v3772_v4 = vsel %vm7781_vm9, %v4820_v48, 0.0  ;;  %v3849_v10 = vmul.f32 %v3771_v63, %v3771_v63  ;;  %v3806_v60 = vadd.f32 %v3805_v25, %v3771_v63  ;;  %v3883_v33 = vadd.f32 %v3882_v26, %v3848_v41 }
 0x260   : > { %5157 = dma.vmem_to_hbm [thread:$0]  (%p5384_p5), %s7775_s6, 4096, %s7773_s9, %s3938_s10, %s5323_s4, %s5323_s4, %s5324_s5   ;;  %v3850_v57 = vmul.f32 %v3772_v4, %v3772_v4 }
 0x261   : > { %v3807_v12 = vadd.f32 %v3806_v60, %v3772_v4  ;;  %v3884_v22 = vadd.f32 %v3883_v33, %v3849_v10  ;;  %s4068_s7 = sshll.u32 %s6896_s29, 1  ;;  %s4267_s6 = sshll.u32 %s5367_s16, 5 }
 0x262   : > { %s174_s8 = scalar_lea.vmem [#allocation4], %s4068_s7  ;;  %s7823_s17 = scalar_lea.hbm %s7869_s3, %s4267_s6 }
 0x263   : > { %v3808_v9 = vrot.slane %v3807_v12, 4  ;;  %v3885_v1 = vadd.f32 %v3884_v22, %v3850_v57  ;;  %s3972_s9 = sshll.u32 %s174_s8, 4  ;;  %s3943_s19 = scalar_lea.sflag [#allocation5], %s6896_s29  ;;  %s7825_s9 = int_to_ptr.vmem [resolvable:$true] %s3972_s9 }
 0x264   : > { %s5254_s20 = scalar_lea.vmem %s7825_s9, 32  ;;  %s5325_s16 = smov [#allocation4]  }
 0x265   : > { %v3809_v15 = vadd.f32 %v3808_v9, %v3807_v12  ;;  %v3886_v32 = vrot.slane %v3885_v1, 4  ;;  %p5255_p1 = scmp.ne.s32.totalorder %s7825_s9, %s5254_s20  ;;  %s5258_s24 = sshll.u32 %s5325_s16, 4  ;;  %s5259_s24 = int_to_ptr.vmem [resolvable:$false] %s5258_s24 }
 0x266   : > { %s5260_s25 = scalar_lea.vmem %s5259_s24, 64  ;;  %p5261_p4 = scmp.lt.s32.totalorder %s7825_s9, %s5259_s24 }
 0x267   : > { %v3810_v14 = vrot.slane %v3809_v15, 2  ;;  %v3887_v11 = vadd.f32 %v3886_v32, %v3885_v1  ;;  %p5256_p2 = pnand %p5255_p1, %p5384_p5  ;;  %p5262_p7 = scmp.lt.s32.totalorder %s5260_s25, %s5254_s20 }
 0x269   : > { %v3811_v53 = vadd.f32 %v3810_v14, %v3809_v15  ;;  %v3888_v5 = vrot.slane %v3887_v11, 2  ;;  %p5257_p3 = pneg %p5256_p2  ;;  %p5263_p8 = por %p5262_p7, %p5261_p4 }
 0x26b   : > { %v3812_v45 = vrot.slane %v3811_v53, 1  ;;  %v3889_v54 = vadd.f32 %v3888_v5, %v3887_v11  ;;  %p5264_p9 = pnand %p5263_p8, %p5257_p3 }
 0x26d   : > { %v3813_v8 = vadd.f32 %v3812_v45, %v3811_v53  ;;  %v3890_v40 = vrot.slane %v3889_v54, 1 }
 0x26f   : > { %3814 = vst [vmem:[%s174_s8] sm:$0x1] %v3813_v8  ;;  %v3891_v62 = vadd.f32 %v3890_v40, %v3889_v54 }
 0x271   : > { %3892 = vst [vmem:[%s174_s8 + $0x1] sm:$0x1] %v3891_v62 }
 0x272   : > { %5267 = shalt.err (!%p5264_p9)
}
 0x273   : > { %s5268_s29 = scalar_lea.hbm %s7823_s17, 32  ;;  %s5272_s28 = scalar_lea.hbm %s7869_s3, 64 }
 0x274   : > { %p5269_p10 = scmp.ne.s32.totalorder %s7823_s17, %s5268_s29  ;;  %p5273_p13 = scmp.lt.u32.totalorder %s7823_s17, %s7869_s3 }
 0x275   : > { %p5274_p0 = scmp.lt.u32.totalorder %s5272_s28, %s5268_s29  ;;  %p5276_p2 = scmp.lt.u32.totalorder %s5268_s29, %s7823_s17 }
 0x276   : > { %p5270_p11 = pnand %p5269_p10, %p5384_p5 }
 0x277   : > { %p5275_p1 = por %p5274_p0, %p5273_p13 }
 0x278   : > { %p5271_p12 = pneg %p5270_p11 }
 0x279   : > { %p5277_p3 = por %p5276_p2, %p5275_p1 }
 0x27b   : > { %p5278_p4 = pnand %p5277_p3, %p5271_p12 }
 0x27d   : > { %5281 = shalt.err (!%p5278_p4)
}
 0x27e   : > { %5158 = dma.vmem_to_hbm [thread:$0]  (%p5384_p5), %s7825_s9, 32, %s7823_s17, %s3943_s19  }
 0x27f PF: > { %p5168_p7 = scmp.ge.s32.totalorder %s5320_s15, 2  ;;  %s3984_s5 = sand.u32 1, %s5308_s12  }
 0x280   : > { %s3985_s7 = scalar_lea.sflag [#allocation3], %s3984_s5 }
 0x281   : > { %p5162_p8 = pnand %p5168_p7, %p5388_p6 }
 0x283   : > { %5299 = dma.done.wait (!%p5162_p8), %s3985_s7, 4096  }
 0x284   : > { %5301 = vsyncadd (!%p5162_p8), %s3985_s7, 4294963200  ;;  %s3994_s6 = scalar_lea.sflag [#allocation5], %s3984_s5 }
 0x285   : > { %5303 = dma.done.wait (!%p5162_p8), %s3994_s6, 32  }
 0x286   : > { %5305 = vsyncadd (!%p5162_p8), %s3994_s6, 4294967264  ;;  %p17_p5 = scmp.ge.s32.totalorder %s5371_s18, 4   ;;  %s8304_s12 = smov %s5312_s13 }
 0x287   : > { %s8305_s13 = smov %s5316_s14  ;;  %s8306_s14 = smov %s5382_s21 }
 0x288   : > { %s8307_s15 = smov %s5371_s18  ;;  %19 = sbr.rel (!%p17_p5) target bundleno = 5 (0x5), region = 88 }
 0x28f   :  { %3999 = vsyncpa [#allocation3], 1 }
 0x290   :  { %4001 = vsyncpa [#allocation3 + $0x1], 1 }
 0x291   :  { %4002 = vsyncpa [#allocation5], 1 }
 0x292   :  { %4004 = vsyncpa [#allocation5 + $0x1], 1 }

</bundles_post_ra>
